<compile_context>
chip_gen: v7x
topology: tpu7x:2x2x1
jax: 0.10.0
libtpu: 0.0.40
codegen_flags: <defaults>
</compile_context>

<pallas_src>
import functools
import math

import jax
import jax.numpy as jnp
from jax.experimental import pallas as pl
from jax.experimental.pallas import tpu as pltpu


# ----------------------------- kernel helpers -----------------------------

def _softmax_lastdim(x, approx):
    m = jnp.max(x, axis=-1, keepdims=True)
    e = jnp.exp(x - m)
    return e * pl.reciprocal(jnp.sum(e, axis=-1, keepdims=True), approx=approx)


# --------------------------------- kernel ---------------------------------

def gat_kernel(h_ref, a_ref, seg_ref, wlin_ref, wqkv_ref, wo_ref, wout_ref,
               bias_ref, out_ref, *, num_heads, head_dim, block_b, nodes,
               approx_recip):
    nh, d, Bt, N = num_heads, head_dim, block_b, nodes
    E = nh * d
    f32 = jnp.float32
    cdt = wlin_ref.dtype          # matmul-operand dtype (bf16 fast path / f32)

    # Packed f32 biases: [blin | bqkv | bo | bout_padded] — all 128-aligned slices.
    blin = bias_ref[:, 0:E]
    bqkv = bias_ref[:, E:4 * E]
    bo = bias_ref[:, 4 * E:5 * E]
    bout = bias_ref[:, 5 * E:]

    # ---- shared dense layers on all Bt*N rows (fat, full-K matmuls) ----
    h = h_ref[...].astype(cdt)                                         # (Bt*N, F)
    h1 = jnp.dot(h, wlin_ref[...], preferred_element_type=f32) + blin  # (Bt*N, E) f32
    h1c = h1.astype(cdt)

    # Fused QKV projection (1/sqrt(head_dim) folded into the Wq columns / bq).
    qkv = jnp.dot(h1c, wqkv_ref[...], preferred_element_type=f32) + bqkv  # (Bt*N, 3E) f32

    # 128-lane-aligned slices; no sub-lane selects.
    q = qkv[:, 0:E].reshape(Bt, N, E)                                  # f32
    k = qkv[:, E:2 * E].reshape(Bt, N, E)
    v = qkv[:, 2 * E:3 * E].reshape(Bt, N, E)

    # ---- adjacency attention mask (per batch, computed ONCE, f32) ----
    h1_3 = h1.reshape(Bt, N, E)
    s = jnp.einsum('bne,bme->bnm', h1_3, h1_3,
                   preferred_element_type=f32)                         # (Bt, N, N)
    s = jnp.where(s > 0, s, 0.2 * s)                                   # LeakyReLU(0.2)
    mask = _softmax_lastdim(s * a_ref[...].astype(f32), approx=False)  # (Bt, N, N) f32

    # ---- multi-head attention, head-blocked along sublanes only ----
    # seg[h*N + n, e] = 1 iff lane e belongs to head h  (block-diagonal selector)
    seg = seg_ref[...]                                                 # (nh*N, E) f32
    q_bd = jnp.tile(q, (1, nh, 1)) * seg[None, :, :]                   # (Bt, nh*N, E) f32
    kc = k.astype(cdt)

    # One full-K=128 contraction per batch element covers every head's QK^T.
    sc = jnp.einsum('bre,bme->brm', q_bd.astype(cdt), kc,
                    preferred_element_type=f32)                        # (Bt, nh*N, N)
    sc = sc.reshape(Bt, nh, N, N) + mask[:, None, :, :]                # additive mask
    p = _softmax_lastdim(sc, approx_recip).reshape(Bt, nh * N, N)      # f32

    # One (nh*N, N)@(N, E) push per batch element; full 128 output lanes.
    pv = jnp.einsum('brm,bme->bre', p.astype(cdt), v.astype(cdt),
                    preferred_element_type=f32)                        # (Bt, nh*N, E)
    # Select each head's d-lane segment and fold the head row-blocks back in:
    attn = jnp.sum((pv * seg[None, :, :]).reshape(Bt, nh, N, E), axis=1)  # (Bt, N, E)
    attn = attn.reshape(Bt * N, E)

    # ---- out_proj: single full-K=128 matmul with the original weight ----
    o = jnp.dot(attn.astype(cdt), wo_ref[...],
                preferred_element_type=f32) + bo                       # (Bt*N, E) f32

    # ---- output_linear (lane-dense padded to 128 columns) ----
    final = jnp.dot(o.astype(cdt), wout_ref[...],
                    preferred_element_type=f32) + bout                 # (Bt*N, P)
    # TODO(synk): nn.Dropout(0.6) (attention-weight dropout and output dropout) is an
    #             inference-mode identity; training-mode stochastic dropout not implemented.
    # TODO(synk): for large N, tile the key dimension (flash-style online softmax) so the
    #             f32 N^2 score/mask buffers never exceed v7x's 64 MiB VMEM.
    out_ref[...] = final.astype(out_ref.dtype)


# -------------------------------- wrapper ----------------------------------

def graph_attention_layer(H, A, params, *, num_heads, block_b=None,
                          weight_dtype=jnp.bfloat16, approx_recip=True):
    B, N, F = H.shape
    E = params["wlin_t"].shape[1]
    out_dim = params["wout_t"].shape[1]
    assert E % num_heads == 0
    d = E // num_heads

    # Single grid step by default: v5e/v6e have one TensorCore, so a split grid
    # only adds ~0.35 µs/step overhead and halves MXU row occupancy.  On v7x
    # with large B, pass block_b = B // 2 to shard across both TensorCores.
    if block_b is None:
        block_b = B
    assert B % block_b == 0
    grid_b = B // block_b

    scale = 1.0 / math.sqrt(d)
    P = max(128, ((out_dim + 127) // 128) * 128)   # lane-dense padded output width

    # ---- pack / pre-transform parameters (layout plumbing, outside the kernel) ----
    wqkv = jnp.concatenate(
        [params["wq_t"] * scale, params["wk_t"], params["wv_t"]], axis=1)   # (E, 3E)
    bqkv = jnp.concatenate(
        [params["bq"] * scale, params["bk"], params["bv"]], axis=1)         # (1, 3E)
    wout_p = jnp.zeros((E, P), jnp.float32).at[:, :out_dim].set(params["wout_t"])
    bout_p = jnp.zeros((1, P), jnp.float32).at[:, :out_dim].set(params["bout"])
    biases = jnp.concatenate(
        [params["blin"], bqkv, params["bo"], bout_p], axis=1
    ).astype(jnp.float32)                                                    # (1, 5E + P)

    wlin = params["wlin_t"].astype(weight_dtype)                             # (F, E)
    wqkv = wqkv.astype(weight_dtype)                                         # (E, 3E)
    wo = params["wo_t"].astype(weight_dtype)                                 # (E, E)
    wout = wout_p.astype(weight_dtype)                                       # (E, P)

    # Block-diagonal head-segment selector: seg[h*N + n, e] = 1 iff e // d == h.
    row_head = jnp.arange(num_heads * N, dtype=jnp.int32) // N
    lane_head = jnp.arange(E, dtype=jnp.int32) // d
    segmask = (row_head[:, None] == lane_head[None, :]).astype(jnp.float32)  # (nh*N, E)

    h2d = H.reshape(B * N, F)

    kernel = functools.partial(
        gat_kernel, num_heads=num_heads, head_dim=d, block_b=block_b,
        nodes=N, approx_recip=approx_recip)

    def invariant(shape):
        nd = len(shape)
        return pl.BlockSpec(shape, lambda b, _nd=nd: (0,) * _nd)

    out2d = pl.pallas_call(
        kernel,
        grid=(grid_b,),
        in_specs=[
            pl.BlockSpec((block_b * N, F), lambda b: (b, 0)),      # H rows
            pl.BlockSpec((block_b, N, N), lambda b: (b, 0, 0)),    # A
            invariant((num_heads * N, E)),                         # head segment mask
            invariant((F, E)),                                     # linear weight
            invariant((E, 3 * E)),                                 # fused QKV weight
            invariant((E, E)),                                     # out_proj weight
            invariant((E, P)),                                     # output_linear (padded)
            invariant((1, 5 * E + P)),                             # packed biases
        ],
        out_specs=pl.BlockSpec((block_b * N, P), lambda b: (b, 0)),
        out_shape=jax.ShapeDtypeStruct((B * N, P), jnp.float32),
        compiler_params=pltpu.CompilerParams(dimension_semantics=("parallel",)),
    )(h2d, A, segmask, wlin, wqkv, wo, wout, biases)

    return out2d[:, :out_dim].reshape(B, N, out_dim)


# --------------------------- pure-JAX reference -----------------------------

def reference(H, A, p, *, num_heads):
    B, N, _ = H.shape
    E = p["wlin_t"].shape[1]
    d = E // num_heads
    h1 = H @ p["wlin_t"] + p["blin"]
    s = jnp.einsum("bnd,bmd->bnm", h1, h1)
    s = jnp.where(s > 0, s, 0.2 * s)
    mask = jax.nn.softmax(s * A, axis=-1)                       # (B, N, N)
    q = h1 @ p["wq_t"] + p["bq"]
    k = h1 @ p["wk_t"] + p["bk"]
    v = h1 @ p["wv_t"] + p["bv"]
    qh = q.reshape(B, N, num_heads, d).transpose(0, 2, 1, 3)
    kh = k.reshape(B, N, num_heads, d).transpose(0, 2, 1, 3)
    vh = v.reshape(B, N, num_heads, d).transpose(0, 2, 1, 3)
    sc = jnp.einsum("bhnd,bhmd->bhnm", qh, kh) / math.sqrt(d) + mask[:, None]
    attn = jax.nn.softmax(sc, axis=-1)
    out = jnp.einsum("bhnm,bhmd->bhnd", attn, vh).transpose(0, 2, 1, 3).reshape(B, N, E)
    out = out @ p["wo_t"] + p["bo"]
    out = out @ p["wout_t"] + p["bout"]
    return out


# ----------------------------------- main -----------------------------------

if __name__ == "__main__":
    B, N = 4, 8
    F = 128          # nn.Linear(128, embed_dim) fixes the input feature dim
    E = 128          # embed_dim
    num_heads = 8
    out_dim = 32

    key = jax.random.PRNGKey(0)
    ks = jax.random.split(key, 16)

    def init(k, shape, scale=0.05):
        return (scale * jax.random.normal(k, shape)).astype(jnp.float32)

    params = {
        "wlin_t": init(ks[0], (F, E)),
        "blin":   init(ks[1], (1, E)),
        "wq_t":   init(ks[2], (E, E)),
        "bq":     init(ks[3], (1, E)),
        "wk_t":   init(ks[4], (E, E)),
        "bk":     init(ks[5], (1, E)),
        "wv_t":   init(ks[6], (E, E)),
        "bv":     init(ks[7], (1, E)),
        "wo_t":   init(ks[8], (E, E)),
        "bo":     init(ks[9], (1, E)),
        "wout_t": init(ks[10], (E, out_dim)),
        "bout":   init(ks[11], (1, out_dim)),
    }

    H = jax.random.normal(ks[12], (B, N, F), dtype=jnp.float32)
    # Adjacency-like matrix (0/1), float.
    A = (jax.random.uniform(ks[13], (B, N, N)) > 0.5).astype(jnp.float32)

    ref = reference(H, A, params, num_heads=num_heads)

    # 1) f32 path, exact reciprocals: tight structural check.
    out_f32 = graph_attention_layer(H, A, params, num_heads=num_heads,
                                    weight_dtype=jnp.float32, approx_recip=False)
    out_f32 = jax.block_until_ready(out_f32)
    assert out_f32.shape == (B, N, out_dim)
    err32 = jnp.max(jnp.abs(out_f32 - ref))
    assert jnp.allclose(out_f32, ref, rtol=1e-3, atol=1e-4), (
        f"f32 path max abs err {err32}"
    )

    # 2) bf16 fast path (default): loose numerical check.
    out_bf16 = graph_attention_layer(H, A, params, num_heads=num_heads)
    out_bf16 = jax.block_until_ready(out_bf16)
    assert out_bf16.shape == (B, N, out_dim)
    err16 = jnp.max(jnp.abs(out_bf16 - ref))
    assert jnp.allclose(out_bf16, ref, rtol=3e-2, atol=1e-2), (
        f"bf16 path max abs err {err16}"
    )

    print("KERNEL_OK")
</pallas_src>

<mosaic_0001>
module attributes {stable_mosaic.version = 11 : i64} {
  func.func @gat_kernel(%arg0: i32, %arg1: memref<32x128xf32, #tpu.memory_space<vmem>>, %arg2: memref<4x8x8xf32, #tpu.memory_space<vmem>>, %arg3: memref<64x128xf32, #tpu.memory_space<vmem>>, %arg4: memref<128x128xf32, #tpu.memory_space<vmem>>, %arg5: memref<128x384xf32, #tpu.memory_space<vmem>>, %arg6: memref<128x128xf32, #tpu.memory_space<vmem>>, %arg7: memref<128x128xf32, #tpu.memory_space<vmem>>, %arg8: memref<1x768xf32, #tpu.memory_space<vmem>>, %arg9: memref<32x128xf32, #tpu.memory_space<vmem>>) attributes {dimension_semantics = [#tpu.dimension_semantics<parallel>], iteration_bounds = array<i64: 1>, scalar_prefetch = 0 : i64, scratch_operands = 0 : i64, tpu.core_type = #tpu.core_type<tc>, window_params = [{transform_indices = @transform_0, window_bounds = array<i64: 32, 128>}, {transform_indices = @transform_1, window_bounds = array<i64: 4, 8, 8>}, {pipeline_mode = #tpu.pipeline_mode<synchronous>, transform_indices = @transform_2, window_bounds = array<i64: 64, 128>}, {pipeline_mode = #tpu.pipeline_mode<synchronous>, transform_indices = @transform_3, window_bounds = array<i64: 128, 128>}, {pipeline_mode = #tpu.pipeline_mode<synchronous>, transform_indices = @transform_4, window_bounds = array<i64: 128, 384>}, {pipeline_mode = #tpu.pipeline_mode<synchronous>, transform_indices = @transform_5, window_bounds = array<i64: 128, 128>}, {pipeline_mode = #tpu.pipeline_mode<synchronous>, transform_indices = @transform_6, window_bounds = array<i64: 128, 128>}, {pipeline_mode = #tpu.pipeline_mode<synchronous>, transform_indices = @transform_7, window_bounds = array<i64: 1, 768>}, {transform_indices = @transform_8, window_bounds = array<i64: 32, 128>}]} {
    %c0 = arith.constant 0 : index
    %c0_0 = arith.constant 0 : index
    %0 = vector.load %arg8[%c0, %c0_0] : memref<1x768xf32, #tpu.memory_space<vmem>>, vector<1x128xf32>
    %c0_1 = arith.constant 0 : index
    %c128 = arith.constant 128 : index
    %1 = vector.load %arg8[%c0_1, %c128] : memref<1x768xf32, #tpu.memory_space<vmem>>, vector<1x384xf32>
    %c0_2 = arith.constant 0 : index
    %c512 = arith.constant 512 : index
    %2 = vector.load %arg8[%c0_2, %c512] : memref<1x768xf32, #tpu.memory_space<vmem>>, vector<1x128xf32>
    %c0_3 = arith.constant 0 : index
    %c640 = arith.constant 640 : index
    %3 = vector.load %arg8[%c0_3, %c640] : memref<1x768xf32, #tpu.memory_space<vmem>>, vector<1x128xf32>
    %c0_4 = arith.constant 0 : index
    %c0_5 = arith.constant 0 : index
    %4 = vector.load %arg1[%c0_4, %c0_5] : memref<32x128xf32, #tpu.memory_space<vmem>>, vector<32x128xf32>
    %c0_6 = arith.constant 0 : index
    %c0_7 = arith.constant 0 : index
    %5 = vector.load %arg4[%c0_6, %c0_7] : memref<128x128xf32, #tpu.memory_space<vmem>>, vector<128x128xf32>
    %cst = arith.constant dense<0.000000e+00> : vector<32x128xf32>
    %6 = tpu.matmul %4, %5, %cst {dimension_numbers = #tpu.dot_dimension_numbers<[1], [0], [0], [1], [0, 0, 1, 1], [], []>} : vector<32x128xf32>, vector<128x128xf32>, vector<32x128xf32> -> vector<32x128xf32>
    %7 = vector.broadcast %0 : vector<1x128xf32> to vector<32x128xf32>
    %8 = arith.addf %6, %7 : vector<32x128xf32>
    %c0_8 = arith.constant 0 : index
    %c0_9 = arith.constant 0 : index
    %9 = vector.load %arg5[%c0_8, %c0_9] : memref<128x384xf32, #tpu.memory_space<vmem>>, vector<128x384xf32>
    %cst_10 = arith.constant dense<0.000000e+00> : vector<32x384xf32>
    %10 = tpu.matmul %8, %9, %cst_10 {dimension_numbers = #tpu.dot_dimension_numbers<[1], [0], [0], [1], [0, 0, 1, 1], [], []>} : vector<32x128xf32>, vector<128x384xf32>, vector<32x384xf32> -> vector<32x384xf32>
    %11 = vector.broadcast %1 : vector<1x384xf32> to vector<32x384xf32>
    %12 = arith.addf %10, %11 : vector<32x384xf32>
    %13 = vector.extract_strided_slice %12 {offsets = [0, 0], sizes = [32, 128], strides = [1, 1]} : vector<32x384xf32> to vector<32x128xf32>
    %14 = vector.shape_cast %13 : vector<32x128xf32> to vector<4x8x128xf32>
    %15 = vector.extract_strided_slice %12 {offsets = [0, 128], sizes = [32, 128], strides = [1, 1]} : vector<32x384xf32> to vector<32x128xf32>
    %16 = vector.shape_cast %15 : vector<32x128xf32> to vector<4x8x128xf32>
    %17 = vector.extract_strided_slice %12 {offsets = [0, 256], sizes = [32, 128], strides = [1, 1]} : vector<32x384xf32> to vector<32x128xf32>
    %18 = vector.shape_cast %17 : vector<32x128xf32> to vector<4x8x128xf32>
    %19 = vector.shape_cast %8 : vector<32x128xf32> to vector<4x8x128xf32>
    "tpu.trace_start"() <{level = 10 : i32, message = "bne,bme->bnm"}> : () -> ()
    %cst_11 = arith.constant dense<0.000000e+00> : vector<4x8x8xf32>
    %20 = tpu.matmul %19, %19, %cst_11 {dimension_numbers = #tpu.dot_dimension_numbers<[2], [2], [1], [1], [0, 0, 0, 1, 1, 1], [0], [0]>} : vector<4x8x128xf32>, vector<4x8x128xf32>, vector<4x8x8xf32> -> vector<4x8x8xf32>
    %cst_12 = arith.constant 0.000000e+00 : f32
    "tpu.trace_stop"() : () -> ()
    %21 = vector.broadcast %cst_12 : f32 to vector<4x8x8xf32>
    %22 = arith.cmpf ogt, %20, %21 : vector<4x8x8xf32>
    %cst_13 = arith.constant 2.000000e-01 : f32
    %23 = vector.broadcast %cst_13 : f32 to vector<4x8x8xf32>
    %24 = arith.mulf %23, %20 : vector<4x8x8xf32>
    %25 = arith.select %22, %20, %24 : vector<4x8x8xi1>, vector<4x8x8xf32>
    %c0_14 = arith.constant 0 : index
    %c0_15 = arith.constant 0 : index
    %c0_16 = arith.constant 0 : index
    %26 = vector.load %arg2[%c0_14, %c0_15, %c0_16] : memref<4x8x8xf32, #tpu.memory_space<vmem>>, vector<4x8x8xf32>
    %27 = arith.mulf %25, %26 : vector<4x8x8xf32>
    %cst_17 = arith.constant dense<0xFF800000> : vector<4x8xf32>
    %28 = vector.multi_reduction <maximumf>, %27, %cst_17 [2] : vector<4x8x8xf32> to vector<4x8xf32>
    %29 = vector.shape_cast %28 : vector<4x8xf32> to vector<4x8x1xf32>
    %30 = vector.broadcast %29 : vector<4x8x1xf32> to vector<4x8x8xf32>
    %31 = arith.subf %27, %30 : vector<4x8x8xf32>
    %32 = math.exp %31 : vector<4x8x8xf32>
    %cst_18 = arith.constant dense<0.000000e+00> : vector<4x8xf32>
    %33 = vector.multi_reduction <add>, %32, %cst_18 [2] : vector<4x8x8xf32> to vector<4x8xf32>
    %34 = vector.shape_cast %33 : vector<4x8xf32> to vector<4x8x1xf32>
    %35 = tpu.reciprocal %34 : vector<4x8x1xf32> -> vector<4x8x1xf32>
    %36 = vector.broadcast %35 : vector<4x8x1xf32> to vector<4x8x8xf32>
    %37 = arith.mulf %32, %36 : vector<4x8x8xf32>
    %c0_19 = arith.constant 0 : index
    %c0_20 = arith.constant 0 : index
    %38 = vector.load %arg3[%c0_19, %c0_20] : memref<64x128xf32, #tpu.memory_space<vmem>>, vector<64x128xf32>
    %39 = tpu.concatenate %14, %14, %14, %14, %14, %14, %14, %14 in 1 : vector<4x8x128xf32>, vector<4x8x128xf32>, vector<4x8x128xf32>, vector<4x8x128xf32>, vector<4x8x128xf32>, vector<4x8x128xf32>, vector<4x8x128xf32>, vector<4x8x128xf32> -> vector<4x64x128xf32>
    %40 = vector.shape_cast %38 : vector<64x128xf32> to vector<1x64x128xf32>
    %41 = vector.broadcast %40 : vector<1x64x128xf32> to vector<4x64x128xf32>
    %42 = arith.mulf %39, %41 : vector<4x64x128xf32>
    "tpu.trace_start"() <{level = 10 : i32, message = "bre,bme->brm"}> : () -> ()
    %cst_21 = arith.constant dense<0.000000e+00> : vector<4x64x8xf32>
    %43 = tpu.matmul %42, %16, %cst_21 {dimension_numbers = #tpu.dot_dimension_numbers<[2], [2], [1], [1], [0, 0, 0, 1, 1, 1], [0], [0]>} : vector<4x64x128xf32>, vector<4x8x128xf32>, vector<4x64x8xf32> -> vector<4x64x8xf32>
    "tpu.trace_stop"() : () -> ()
    %44 = vector.shape_cast %43 : vector<4x64x8xf32> to vector<4x8x8x8xf32>
    %45 = vector.shape_cast %37 : vector<4x8x8xf32> to vector<4x1x8x8xf32>
    %46 = vector.broadcast %45 : vector<4x1x8x8xf32> to vector<4x8x8x8xf32>
    %47 = arith.addf %44, %46 : vector<4x8x8x8xf32>
    %cst_22 = arith.constant dense<0xFF800000> : vector<4x8x8xf32>
    %48 = vector.multi_reduction <maximumf>, %47, %cst_22 [3] : vector<4x8x8x8xf32> to vector<4x8x8xf32>
    %49 = vector.shape_cast %48 : vector<4x8x8xf32> to vector<4x8x8x1xf32>
    %50 = vector.broadcast %49 : vector<4x8x8x1xf32> to vector<4x8x8x8xf32>
    %51 = arith.subf %47, %50 : vector<4x8x8x8xf32>
    %52 = math.exp %51 : vector<4x8x8x8xf32>
    %cst_23 = arith.constant dense<0.000000e+00> : vector<4x8x8xf32>
    %53 = vector.multi_reduction <add>, %52, %cst_23 [3] : vector<4x8x8x8xf32> to vector<4x8x8xf32>
    %54 = vector.shape_cast %53 : vector<4x8x8xf32> to vector<4x8x8x1xf32>
    %55 = tpu.reciprocal %54 : vector<4x8x8x1xf32> -> vector<4x8x8x1xf32>
    %56 = vector.broadcast %55 : vector<4x8x8x1xf32> to vector<4x8x8x8xf32>
    %57 = arith.mulf %52, %56 : vector<4x8x8x8xf32>
    %58 = vector.shape_cast %57 : vector<4x8x8x8xf32> to vector<4x64x8xf32>
    "tpu.trace_start"() <{level = 10 : i32, message = "brm,bme->bre"}> : () -> ()
    %cst_24 = arith.constant dense<0.000000e+00> : vector<4x64x128xf32>
    %59 = tpu.matmul %58, %18, %cst_24 {dimension_numbers = #tpu.dot_dimension_numbers<[2], [1], [1], [2], [0, 0, 0, 1, 1, 2], [0], [0]>} : vector<4x64x8xf32>, vector<4x8x128xf32>, vector<4x64x128xf32> -> vector<4x64x128xf32>
    "tpu.trace_stop"() : () -> ()
    %60 = vector.shape_cast %38 : vector<64x128xf32> to vector<1x64x128xf32>
    %61 = vector.broadcast %60 : vector<1x64x128xf32> to vector<4x64x128xf32>
    %62 = arith.mulf %59, %61 : vector<4x64x128xf32>
    %63 = vector.shape_cast %62 : vector<4x64x128xf32> to vector<4x8x8x128xf32>
    %cst_25 = arith.constant dense<0.000000e+00> : vector<4x8x128xf32>
    %64 = vector.multi_reduction <add>, %63, %cst_25 [1] : vector<4x8x8x128xf32> to vector<4x8x128xf32>
    %65 = vector.shape_cast %64 : vector<4x8x128xf32> to vector<32x128xf32>
    %c0_26 = arith.constant 0 : index
    %c0_27 = arith.constant 0 : index
    %66 = vector.load %arg6[%c0_26, %c0_27] : memref<128x128xf32, #tpu.memory_space<vmem>>, vector<128x128xf32>
    %cst_28 = arith.constant dense<0.000000e+00> : vector<32x128xf32>
    %67 = tpu.matmul %65, %66, %cst_28 {dimension_numbers = #tpu.dot_dimension_numbers<[1], [0], [0], [1], [0, 0, 1, 1], [], []>} : vector<32x128xf32>, vector<128x128xf32>, vector<32x128xf32> -> vector<32x128xf32>
    %68 = vector.broadcast %2 : vector<1x128xf32> to vector<32x128xf32>
    %69 = arith.addf %67, %68 : vector<32x128xf32>
    %c0_29 = arith.constant 0 : index
    %c0_30 = arith.constant 0 : index
    %70 = vector.load %arg7[%c0_29, %c0_30] : memref<128x128xf32, #tpu.memory_space<vmem>>, vector<128x128xf32>
    %cst_31 = arith.constant dense<0.000000e+00> : vector<32x128xf32>
    %71 = tpu.matmul %69, %70, %cst_31 {dimension_numbers = #tpu.dot_dimension_numbers<[1], [0], [0], [1], [0, 0, 1, 1], [], []>} : vector<32x128xf32>, vector<128x128xf32>, vector<32x128xf32> -> vector<32x128xf32>
    %72 = vector.broadcast %3 : vector<1x128xf32> to vector<32x128xf32>
    %73 = arith.addf %71, %72 : vector<32x128xf32>
    %c0_32 = arith.constant 0 : index
    %c0_33 = arith.constant 0 : index
    %74 = vector.load %arg9[%c0_32, %c0_33] : memref<32x128xf32, #tpu.memory_space<vmem>>, vector<32x128xf32>
    tpu.vector_store %arg9[%c0_32, %c0_33], %73 {strides = array<i32>} : memref<32x128xf32, #tpu.memory_space<vmem>>, vector<32x128xf32>,
    return
  }
  func.func @transform_0(%arg0: i32) -> (i32, i32) {
    %c0_i32 = arith.constant 0 : i32
    %c0_i32_0 = arith.constant 0 : i32
    return %arg0, %c0_i32 : i32, i32
  }
  func.func @transform_1(%arg0: i32) -> (i32, i32, i32) {
    %c0_i32 = arith.constant 0 : i32
    %c0_i32_0 = arith.constant 0 : i32
    %c0_i32_1 = arith.constant 0 : i32
    return %arg0, %c0_i32, %c0_i32_0 : i32, i32, i32
  }
  func.func @transform_2(%arg0: i32) -> (i32, i32) {
    %c0_i32 = arith.constant 0 : i32
    %c0_i32_0 = arith.constant 0 : i32
    %c0_i32_1 = arith.constant 0 : i32
    return %c0_i32, %c0_i32_0 : i32, i32
  }
  func.func @transform_3(%arg0: i32) -> (i32, i32) {
    %c0_i32 = arith.constant 0 : i32
    %c0_i32_0 = arith.constant 0 : i32
    %c0_i32_1 = arith.constant 0 : i32
    return %c0_i32, %c0_i32_0 : i32, i32
  }
  func.func @transform_4(%arg0: i32) -> (i32, i32) {
    %c0_i32 = arith.constant 0 : i32
    %c0_i32_0 = arith.constant 0 : i32
    %c0_i32_1 = arith.constant 0 : i32
    return %c0_i32, %c0_i32_0 : i32, i32
  }
  func.func @transform_5(%arg0: i32) -> (i32, i32) {
    %c0_i32 = arith.constant 0 : i32
    %c0_i32_0 = arith.constant 0 : i32
    %c0_i32_1 = arith.constant 0 : i32
    return %c0_i32, %c0_i32_0 : i32, i32
  }
  func.func @transform_6(%arg0: i32) -> (i32, i32) {
    %c0_i32 = arith.constant 0 : i32
    %c0_i32_0 = arith.constant 0 : i32
    %c0_i32_1 = arith.constant 0 : i32
    return %c0_i32, %c0_i32_0 : i32, i32
  }
  func.func @transform_7(%arg0: i32) -> (i32, i32) {
    %c0_i32 = arith.constant 0 : i32
    %c0_i32_0 = arith.constant 0 : i32
    %c0_i32_1 = arith.constant 0 : i32
    return %c0_i32, %c0_i32_0 : i32, i32
  }
  func.func @transform_8(%arg0: i32) -> (i32, i32) {
    %c0_i32 = arith.constant 0 : i32
    %c0_i32_0 = arith.constant 0 : i32
    return %arg0, %c0_i32 : i32, i32
  }
}

</mosaic_0001>

<bundles_post_ra>
// kernel: tpu_custom_call.1
= control target key start
LH: loop header
LB: loop body
LE: loop exit
PB: predicated region body
PF: predicated region fallthrough
CT: control target
= control target key end

     0   :  { %13 = vsyncpa [#allocation3], 0  ;;  %s4295_s0 = inlined_call_operand.hbm [shape: f32[32,128], index: 0, kind: input, shape index: {}]   ;;  %s4296_s1 = inlined_call_operand.hbm [shape: f32[4,8,8], index: 1, kind: input, shape index: {}]   ;;  %s4297_s2 = inlined_call_operand.hbm [shape: f32[64,128], index: 2, kind: input, shape index: {}]   ;;  %s4298_s3 = inlined_call_operand.hbm [shape: f32[128,128], index: 3, kind: input, shape index: {}]   ;;  %s4299_s4 = inlined_call_operand.hbm [shape: f32[128,384], index: 4, kind: input, shape index: {}]   ;;  %s4300_s5 = inlined_call_operand.hbm [shape: f32[128,128], index: 5, kind: input, shape index: {}]   ;;  %s4301_s6 = inlined_call_operand.hbm [shape: f32[128,128], index: 6, kind: input, shape index: {}]   ;;  %s4302_s7 = inlined_call_operand.vmem [shape: f32[1,768], index: 7, kind: input, shape index: {}]   ;;  %s4303_s8 = inlined_call_operand.hbm [shape: f32[32,128], index: 8, kind: output, shape index: {}]  }
   0x1   :  { %14 = vsyncpa [#allocation6], 0 }
   0x2   :  { %15 = vsyncpa [#allocation9], 0 }
   0x3   :  { %16 = vsyncpa [#allocation12], 0 }
   0x4   :  { %17 = vsyncpa [#allocation4], 0  ;;  %s3474_s27 = smov [#allocation5]   ;;  %s3475_s29 = smov [#allocation8]  }
   0x5   :  { %s35_s28 = sshll.u32 %s3474_s27, 4  ;;  %s59_s30 = sshll.u32 %s3475_s29, 4  ;;  %s36_s28 = int_to_ptr.vmem [resolvable:$true] %s35_s28  ;;  %s3533_s30 = int_to_ptr.vmem [resolvable:$true] %s59_s30 }
   0x6   :  { %s3288_s11 = scalar_lea.hbm %s4296_s1, 512 }
   0x7   :  { %p3289_p0 = scmp.ne.s32.totalorder %s4296_s1, %s3288_s11  ;;  %p3292_p1 = scmp.lt.u32.totalorder %s3288_s11, %s4296_s1 }
   0x9   :  { %p3294_p2 = pnand %p3292_p1, %p3289_p0 }
   0xb   :  { %3297 = shalt.err (!%p3294_p2)
}
   0xc   :  { %s3298_s16 = scalar_lea.vmem %s36_s28, 512  ;;  %p3303_p4 = scmp.lt.s32.totalorder %s36_s28, %s36_s28 }
   0xd   :  { %p3299_p3 = scmp.ne.s32.totalorder %s36_s28, %s3298_s16  ;;  %p3304_p5 = scmp.lt.s32.totalorder %s3298_s16, %s3298_s16 }
   0xf   :  { %p3305_p6 = por %p3304_p5, %p3303_p4 }
  0x11   :  { %p3306_p7 = pnand %p3305_p6, %p3299_p3 }
  0x13   :  { %3309 = shalt.err (!%p3306_p7)
}
  0x14   :  { %s3476_s17 = smov 128   ;;  %s3477_s18 = smov 8  }
  0x15   :  { %41 = dma.hbm_to_vmem [thread:$0]  %s4296_s1, 512, %s36_s28, [#allocation6], %s3476_s17, %s3476_s17, %s3477_s18  }
  0x16   :  { %s3310_s23 = scalar_lea.hbm %s4298_s3, 2048 }
  0x17   :  { %p3311_p8 = scmp.ne.s32.totalorder %s4298_s3, %s3310_s23  ;;  %p3314_p9 = scmp.lt.u32.totalorder %s3310_s23, %s4298_s3 }
  0x19   :  { %p3316_p10 = pnand %p3314_p9, %p3311_p8 }
  0x1b   :  { %3319 = shalt.err (!%p3316_p10)
}
  0x1c   :  { %s3320_s29 = scalar_lea.vmem %s3533_s30, 2048  ;;  %p3325_p12 = scmp.lt.s32.totalorder %s3533_s30, %s3533_s30 }
  0x1d   :  { %p3321_p11 = scmp.ne.s32.totalorder %s3533_s30, %s3320_s29  ;;  %p3326_p13 = scmp.lt.s32.totalorder %s3320_s29, %s3320_s29 }
  0x1f   :  { %p3327_p0 = por %p3326_p13, %p3325_p12 }
  0x21   :  { %p3328_p1 = pnand %p3327_p0, %p3321_p11 }
  0x23   :  { %3331 = shalt.err (!%p3328_p1)
}
  0x24   :  { %65 = dma.hbm_to_vmem [thread:$0]  %s4298_s3, 2048, %s3533_s30, [#allocation9], %s3476_s17, %s3476_s17, %s3477_s18  }
  0x25   :  { %s3478_s9 = smov [#allocation11]   ;;  %s3479_s11 = smov [#allocation2]  }
  0x26   :  { %s83_s10 = sshll.u32 %s3478_s9, 4  ;;  %s23_s12 = sshll.u32 %s3479_s11, 4  ;;  %s84_s10 = int_to_ptr.vmem [resolvable:$true] %s83_s10  ;;  %s3570_s12 = int_to_ptr.vmem [resolvable:$true] %s23_s12 }
  0x27   :  { %s3332_s15 = scalar_lea.hbm %s4300_s5, 2048 }
  0x28   :  { %p3333_p2 = scmp.ne.s32.totalorder %s4300_s5, %s3332_s15  ;;  %p3336_p3 = scmp.lt.u32.totalorder %s3332_s15, %s4300_s5 }
  0x2a   :  { %p3338_p4 = pnand %p3336_p3, %p3333_p2 }
  0x2c   :  { %3341 = shalt.err (!%p3338_p4)
}
  0x2d   :  { %s3342_s3 = scalar_lea.vmem %s84_s10, 2048  ;;  %p3347_p6 = scmp.lt.s32.totalorder %s84_s10, %s84_s10 }
  0x2e   :  { %p3343_p5 = scmp.ne.s32.totalorder %s84_s10, %s3342_s3  ;;  %p3348_p7 = scmp.lt.s32.totalorder %s3342_s3, %s3342_s3 }
  0x30   :  { %p3349_p8 = por %p3348_p7, %p3347_p6 }
  0x32   :  { %p3350_p9 = pnand %p3349_p8, %p3343_p5 }
  0x34   :  { %3353 = shalt.err (!%p3350_p9)
}
  0x35   :  { %89 = dma.hbm_to_vmem [thread:$0]  %s4300_s5, 2048, %s84_s10, [#allocation12], %s3476_s17, %s3476_s17, %s3477_s18  }
  0x36   :  { %s3354_s25 = scalar_lea.hbm %s4295_s0, 512 }
  0x37   :  { %p3355_p10 = scmp.ne.s32.totalorder %s4295_s0, %s3354_s25  ;;  %p3358_p11 = scmp.lt.u32.totalorder %s3354_s25, %s4295_s0 }
  0x39   :  { %p3360_p12 = pnand %p3358_p11, %p3355_p10 }
  0x3b   :  { %3363 = shalt.err (!%p3360_p12)
}
  0x3c   :  { %s3364_s28 = scalar_lea.vmem %s3570_s12, 512  ;;  %p3369_p0 = scmp.lt.s32.totalorder %s3570_s12, %s3570_s12 }
  0x3d   :  { %p3365_p13 = scmp.ne.s32.totalorder %s3570_s12, %s3364_s28  ;;  %p3370_p1 = scmp.lt.s32.totalorder %s3364_s28, %s3364_s28 }
  0x3f   :  { %p3371_p2 = por %p3370_p1, %p3369_p0 }
  0x41   :  { %p3372_p3 = pnand %p3371_p2, %p3365_p13 }
  0x43   :  { %3375 = shalt.err (!%p3372_p3)
}
  0x44   :  { %29 = dma.hbm_to_vmem [thread:$0]  %s4295_s0, 512, %s3570_s12, [#allocation3], %s3476_s17, %s3476_s17, %s3477_s18  }
  0x45   :  { %s3480_s10 = smov [#allocation7]   ;;  %s3481_s13 = smov [#allocation10]  }
  0x46   :  { %s47_s11 = sshll.u32 %s3480_s10, 4  ;;  %s71_s14 = sshll.u32 %s3481_s13, 4  ;;  %s48_s11 = int_to_ptr.vmem [resolvable:$true] %s47_s11  ;;  %s3607_s14 = int_to_ptr.vmem [resolvable:$true] %s71_s14 }
  0x47   :  { %s3376_s19 = scalar_lea.hbm %s4297_s2, 1024 }
  0x48   :  { %p3377_p4 = scmp.ne.s32.totalorder %s4297_s2, %s3376_s19  ;;  %p3380_p5 = scmp.lt.u32.totalorder %s3376_s19, %s4297_s2 }
  0x4a   :  { %p3382_p6 = pnand %p3380_p5, %p3377_p4 }
  0x4c   :  { %3385 = shalt.err (!%p3382_p6)
}
  0x4d   :  { %s3386_s0 = scalar_lea.vmem %s48_s11, 1024  ;;  %p3391_p8 = scmp.lt.s32.totalorder %s48_s11, %s48_s11 }
  0x4e   :  { %p3387_p7 = scmp.ne.s32.totalorder %s48_s11, %s3386_s0  ;;  %p3392_p9 = scmp.lt.s32.totalorder %s3386_s0, %s3386_s0 }
  0x50   :  { %p3393_p10 = por %p3392_p9, %p3391_p8 }
  0x52   :  { %p3394_p11 = pnand %p3393_p10, %p3387_p7 }
  0x54   :  { %3397 = shalt.err (!%p3394_p11)
}
  0x55   :  { %53 = dma.hbm_to_vmem [thread:$0]  %s4297_s2, 1024, %s48_s11, [#allocation6], %s3476_s17, %s3476_s17, %s3477_s18  }
  0x56   :  { %s3398_s25 = scalar_lea.hbm %s4299_s4, 6144 }
  0x57   :  { %p3399_p12 = scmp.ne.s32.totalorder %s4299_s4, %s3398_s25  ;;  %p3402_p13 = scmp.lt.u32.totalorder %s3398_s25, %s4299_s4 }
  0x59   :  { %p3404_p0 = pnand %p3402_p13, %p3399_p12 }
  0x5b   :  { %3407 = shalt.err (!%p3404_p0)
}
  0x5c   :  { %s3408_s28 = scalar_lea.vmem %s3607_s14, 6144  ;;  %p3413_p2 = scmp.lt.s32.totalorder %s3607_s14, %s3607_s14 }
  0x5d   :  { %p3409_p1 = scmp.ne.s32.totalorder %s3607_s14, %s3408_s28  ;;  %p3414_p3 = scmp.lt.s32.totalorder %s3408_s28, %s3408_s28 }
  0x5f   :  { %p3415_p4 = por %p3414_p3, %p3413_p2 }
  0x61   :  { %p3416_p5 = pnand %p3415_p4, %p3409_p1 }
  0x63   :  { %3419 = shalt.err (!%p3416_p5)
}
  0x64   :  { %s3482_s2 = smov 384   ;;  %s3483_s5 = smov 24  }
  0x65   :  { %77 = dma.hbm_to_vmem [thread:$0]  %s4299_s4, 6144, %s3607_s14, [#allocation9], %s3482_s2, %s3482_s2, %s3483_s5  }
  0x66   :  { %s3484_s11 = smov [#allocation13]   ;;  %s3420_s19 = scalar_lea.hbm %s4301_s6, 2048 }
  0x67   :  { %s95_s13 = sshll.u32 %s3484_s11, 4  ;;  %p3421_p6 = scmp.ne.s32.totalorder %s4301_s6, %s3420_s19  ;;  %s96_s13 = int_to_ptr.vmem [resolvable:$true] %s95_s13 }
  0x68   :  { %p3424_p7 = scmp.lt.u32.totalorder %s3420_s19, %s4301_s6 }
  0x6a   :  { %p3426_p8 = pnand %p3424_p7, %p3421_p6 }
  0x6c   :  { %3429 = shalt.err (!%p3426_p8)
}
  0x6d   :  { %s3430_s0 = scalar_lea.vmem %s96_s13, 2048  ;;  %p3435_p10 = scmp.lt.s32.totalorder %s96_s13, %s96_s13 }
  0x6e   :  { %p3431_p9 = scmp.ne.s32.totalorder %s96_s13, %s3430_s0  ;;  %p3436_p11 = scmp.lt.s32.totalorder %s3430_s0, %s3430_s0 }
  0x70   :  { %p3437_p12 = por %p3436_p11, %p3435_p10 }
  0x72   :  { %p3438_p13 = pnand %p3437_p12, %p3431_p9 }
  0x74   :  { %3441 = shalt.err (!%p3438_p13)
}
  0x75   :  { %101 = dma.hbm_to_vmem [thread:$0]  %s4301_s6, 2048, %s96_s13, [#allocation12], %s3476_s17, %s3476_s17, %s3477_s18  }
  0x76   :  { %3464 = dma.done.wait [#allocation3], 512  }
  0x77   :  { %3465 = vsyncadd [#allocation3], 4294966784 }
  0x78   :  { %3466 = dma.done.wait [#allocation6], 1536  }
  0x79   :  { %3467 = vsyncadd [#allocation6], 4294965760 }
  0x7a   :  { %3468 = dma.done.wait [#allocation9], 8192  }
  0x7b   :  { %3469 = vsyncadd [#allocation9], 4294959104 }
  0x7c   :  { %3470 = dma.done.wait [#allocation12], 4096  }
  0x7d   :  { %3471 = vsyncadd [#allocation12], 4294963200  ;;  %v133_v0 = vld [vmem:[#allocation8] sm:$0xff]  ;;  %v134_v1 = vld [vmem:[#allocation8 + $0x8] sm:$0xff]  ;;  %vm3486_vm0 = vmmov 0   ;;  %vm778_vm2 = vcmask 64512  }
  0x7e   :  { %v135_v2 = vld [vmem:[#allocation8 + $0x10] sm:$0xff]  ;;  %v2960_v3 = vpack.c.bf16 %v134_v1, %v133_v0  ;;  %v136_v4 = vld [vmem:[#allocation8 + $0x18] sm:$0xff]  ;;  %v137_v6 = vld [vmem:[#allocation8 + $0x20] sm:$0xff]  ;;  %s3487_s29 = smov [#allocation14]  }
  0x7f   :  { %v2964_v5 = vpack.c.bf16 %v136_v4, %v135_v2  ;;  %v138_v7 = vld [vmem:[#allocation8 + $0x28] sm:$0xff]  ;;  %v129_v9 = vld [vmem:[#allocation2] sm:$0xff]  ;;  %v139_v10 = vld [vmem:[#allocation8 + $0x30] sm:$0xff]  ;;  %s2466_s1 = sshll.u32 %s3487_s29, 4  ;;  %s2467_s1 = int_to_ptr.vmem [resolvable:$true] %s2466_s1 }
  0x80   :  { %2961 = vmatprep.subr.bf16.mxu0 %v2960_v3  ;;  %v2968_v8 = vpack.c.bf16 %v138_v7, %v137_v6  ;;  %v140_v11 = vld [vmem:[#allocation8 + $0x38] sm:$0xff]  ;;  %2708 = vmatprep.mubr.f32.mxu0 %v129_v9  ;;  %v241_v12 = vld [vmem:[#allocation10 + $0x8] sm:$0xff]  ;;  %v244_v13 = vld [vmem:[#allocation10 + $0x20] sm:$0xff]  ;;  %s3442_s28 = scalar_lea.vmem %s2467_s1, 512  ;;  %p3447_p1 = scmp.lt.s32.totalorder %s2467_s1, %s2467_s1 }
  0x81   :  { %2963 = vmatpush3.bf16.msra.mxu0 %v2960_v3  ;;  %v240_v14 = vld [vmem:[#allocation10] sm:$0xff]  ;;  %v243_v15 = vld [vmem:[#allocation10 + $0x18] sm:$0xff]  ;;  %v2992_v16 = vpack.c.bf16 %v244_v13, %v241_v12  ;;  %v250_v19 = vld [vmem:[#allocation10 + $0x50] sm:$0xff]  ;;  %v2972_v21 = vpack.c.bf16 %v140_v11, %v139_v10  ;;  %p3443_p0 = scmp.ne.s32.totalorder %s2467_s1, %s3442_s28  ;;  %p3448_p2 = scmp.lt.s32.totalorder %s3442_s28, %s3442_s28 }
  0x82   :  { %2965 = vmatprep.subr.bf16.mxu0 %v2964_v5  ;;  %v2994_v17 = vpack.c.bf16 %v243_v15, %v240_v14  ;;  %v247_v18 = vld [vmem:[#allocation10 + $0x38] sm:$0xff]  ;;  %v246_v20 = vld [vmem:[#allocation10 + $0x30] sm:$0xff]  ;;  %v141_v22 = vld [vmem:[#allocation8 + $0x40] sm:$0xff] }
  0x83   :  { %v2996_v23 = vpack.c.bf16 %v250_v19, %v247_v18  ;;  %v249_v24 = vld [vmem:[#allocation10 + $0x48] sm:$0xff]  ;;  %2993 = vmatprep.subr.bf16.mxu1 %v2992_v16  ;;  %v256_v27 = vld [vmem:[#allocation10 + $0x80] sm:$0xff]  ;;  %v255_v31 = vld [vmem:[#allocation10 + $0x78] sm:$0xff]  ;;  %p3449_p3 = por %p3448_p2, %p3447_p1 }
  0x84   :  { %v142_v25 = vld [vmem:[#allocation8 + $0x48] sm:$0xff]  ;;  %2995 = vmatpush1.bf16.msra.mxu1 %v2994_v17  ;;  %v2998_v28 = vpack.c.bf16 %v249_v24, %v246_v20  ;;  %v252_v30 = vld [vmem:[#allocation10 + $0x60] sm:$0xff]  ;;  %v259_v33 = vld [vmem:[#allocation10 + $0x98] sm:$0xff] }
  0x85   :  { %2967 = vmatpush3.bf16.msra.mxu0 %v2964_v5  ;;  %v253_v26 = vld [vmem:[#allocation10 + $0x68] sm:$0xff]  ;;  %2997 = vmatprep.subr.bf16.mxu1 %v2996_v23  ;;  %v2976_v32 = vpack.c.bf16 %v142_v25, %v141_v22  ;;  %v262_v34 = vld [vmem:[#allocation10 + $0xb0] sm:$0xff]  ;;  %v144_v36 = vld [vmem:[#allocation8 + $0x58] sm:$0xff]  ;;  %v3002_v37 = vpack.c.bf16 %v255_v31, %v252_v30  ;;  %p3450_p4 = pnand %p3449_p3, %p3443_p0 }
  0x86   :  { %2969 = vmatprep.subr.bf16.mxu0 %v2968_v8  ;;  %v3000_v29 = vpack.c.bf16 %v256_v27, %v253_v26  ;;  %v143_v35 = vld [vmem:[#allocation8 + $0x50] sm:$0xff]  ;;  %v3004_v38 = vpack.c.bf16 %v262_v34, %v259_v33  ;;  %v261_v40 = vld [vmem:[#allocation10 + $0xa8] sm:$0xff]  ;;  %v268_v43 = vld [vmem:[#allocation10 + $0xe0] sm:$0xff] }
  0x87   :  { %v258_v39 = vld [vmem:[#allocation10 + $0x90] sm:$0xff]  ;;  %v2980_v41 = vpack.c.bf16 %v144_v36, %v143_v35  ;;  %v265_v42 = vld [vmem:[#allocation10 + $0xc8] sm:$0xff]  ;;  %v145_v44 = vld [vmem:[#allocation8 + $0x60] sm:$0xff]  ;;  %v3485_v36 = vmov 0.0  }
  0x88   :  { %2999 = vmatpush1.bf16.msra.mxu1 %v2998_v28  ;;  %v146_v45 = vld [vmem:[#allocation8 + $0x68] sm:$0xff]  ;;  %v3006_v46 = vpack.c.bf16 %v261_v40, %v258_v39  ;;  %v3008_v47 = vpack.c.bf16 %v268_v43, %v265_v42  ;;  %v264_v48 = vld [vmem:[#allocation10 + $0xc0] sm:$0xff]  ;;  %v267_v49 = vld [vmem:[#allocation10 + $0xd8] sm:$0xff]  ;;  %368 = vmatprep.mubr.f32.mxu1 %v3485_v36 }
  0x89   :  { %2971 = vmatpush3.bf16.msra.mxu0 %v2968_v8  ;;  %3001 = vmatprep.subr.bf16.mxu1 %v3000_v29  ;;  %v2984_v50 = vpack.c.bf16 %v146_v45, %v145_v44  ;;  %v271_v51 = vld [vmem:[#allocation10 + $0xf8] sm:$0xff]  ;;  %v274_v52 = vld [vmem:[#allocation10 + $0x110] sm:$0xff]  ;;  %v3010_v55 = vpack.c.bf16 %v267_v49, %v264_v48  ;;  %v273_v58 = vld [vmem:[#allocation10 + $0x108] sm:$0xff] }
  0x8a   :  { %2973 = vmatprep.subr.bf16.mxu0 %v2972_v21  ;;  %v147_v53 = vld [vmem:[#allocation8 + $0x70] sm:$0xff]  ;;  %v148_v54 = vld [vmem:[#allocation8 + $0x78] sm:$0xff]  ;;  %v3012_v56 = vpack.c.bf16 %v274_v52, %v271_v51  ;;  %v277_v60 = vld [vmem:[#allocation10 + $0x128] sm:$0xff] }
  0x8b   :  { %v270_v57 = vld [vmem:[#allocation10 + $0xf0] sm:$0xff]  ;;  %v2988_v59 = vpack.c.bf16 %v148_v54, %v147_v53  ;;  %v280_v61 = vld [vmem:[#allocation10 + $0x140] sm:$0xff]  ;;  %v245_v63 = vld [vmem:[#allocation10 + $0x28] sm:$0xff] }
  0x8c   :  { %3003 = vmatpush1.bf16.msra.mxu1 %v3002_v37  ;;  %v242_v62 = vld [vmem:[#allocation10 + $0x10] sm:$0xff]  ;;  %v3014_v0 = vpack.c.bf16 %v273_v58, %v270_v57  ;;  %v3016_v1 = vpack.c.bf16 %v280_v61, %v277_v60  ;;  %v276_v2 = vld [vmem:[#allocation10 + $0x120] sm:$0xff]  ;;  %v279_v3 = vld [vmem:[#allocation10 + $0x138] sm:$0xff] }
  0x8d   :  { %2975 = vmatpush3.bf16.msra.mxu0 %v2972_v21  ;;  %3005 = vmatprep.subr.bf16.mxu1 %v3004_v38  ;;  %v3024_v4 = vpack.c.bf16 %v245_v63, %v242_v62  ;;  %v248_v5 = vld [vmem:[#allocation10 + $0x40] sm:$0xff]  ;;  %v251_v6 = vld [vmem:[#allocation10 + $0x58] sm:$0xff]  ;;  %v286_v8 = vld [vmem:[#allocation10 + $0x170] sm:$0xff]  ;;  %v3018_v9 = vpack.c.bf16 %v279_v3, %v276_v2 }
  0x8e   :  { %2977 = vmatprep.subr.bf16.mxu0 %v2976_v32  ;;  %v283_v7 = vld [vmem:[#allocation10 + $0x158] sm:$0xff]  ;;  %v130_v10 = vld [vmem:[#allocation2 + $0x8] sm:$0xff]  ;;  %v282_v11 = vld [vmem:[#allocation10 + $0x150] sm:$0xff]  ;;  %v3028_v14 = vpack.c.bf16 %v251_v6, %v248_v5 }
  0x8f   :  { %v285_v12 = vld [vmem:[#allocation10 + $0x168] sm:$0xff]  ;;  %v131_v13 = vld [vmem:[#allocation2 + $0x10] sm:$0xff]  ;;  %v3020_v15 = vpack.c.bf16 %v286_v8, %v283_v7  ;;  %v132_v19 = vld [vmem:[#allocation2 + $0x18] sm:$0xff] }
  0x90   :  { %3007 = vmatpush1.bf16.msra.mxu1 %v3006_v46  ;;  %v254_v16 = vld [vmem:[#allocation10 + $0x70] sm:$0xff]  ;;  %v257_v17 = vld [vmem:[#allocation10 + $0x88] sm:$0xff]  ;;  %v3022_v18 = vpack.c.bf16 %v285_v12, %v282_v11  ;;  %v260_v21 = vld [vmem:[#allocation10 + $0xa0] sm:$0xff]  ;;  %v289_v46 = vlaneseq }
  0x91   :  { %2979 = vmatpush3.bf16.msra.mxu0 %v2976_v32  ;;  %3009 = vmatprep.subr.bf16.mxu1 %v3008_v47  ;;  %v3032_v20 = vpack.c.bf16 %v257_v17, %v254_v16  ;;  %v263_v22 = vld [vmem:[#allocation10 + $0xb8] sm:$0xff]  ;;  %v266_v24 = vld [vmem:[#allocation10 + $0xd0] sm:$0xff]  ;;  %v269_v25 = vld [vmem:[#allocation10 + $0xe8] sm:$0xff] }
  0x92   :  { %2981 = vmatprep.subr.bf16.mxu0 %v2980_v41  ;;  %v3036_v23 = vpack.c.bf16 %v263_v22, %v260_v21  ;;  %v3040_v26 = vpack.c.bf16 %v269_v25, %v266_v24  ;;  %v272_v27 = vld [vmem:[#allocation10 + $0x100] sm:$0xff]  ;;  %v275_v28 = vld [vmem:[#allocation10 + $0x118] sm:$0xff]  ;;  %v278_v30 = vld [vmem:[#allocation10 + $0x130] sm:$0xff]  ;;  %v290_v47 = vshrl.u32 %v289_v46, 7 }
  0x93   :  { %v3044_v29 = vpack.c.bf16 %v275_v28, %v272_v27  ;;  %v281_v31 = vld [vmem:[#allocation10 + $0x148] sm:$0xff]  ;;  %v284_v33 = vld [vmem:[#allocation10 + $0x160] sm:$0xff]  ;;  %v287_v34 = vld [vmem:[#allocation10 + $0x178] sm:$0xff] }
  0x94   :  { %3011 = vmatpush1.bf16.msra.mxu1 %v3010_v55  ;;  %v3048_v32 = vpack.c.bf16 %v281_v31, %v278_v30  ;;  %v3052_v35 = vpack.c.bf16 %v287_v34, %v284_v33  ;;  %v2481_v37 = vld [vmem:[%s4302_s7] ss:$0 sm:$0xff]  ;;  %v291_v48 = vsub.s32 0, %v290_v47  ;;  %v126_v49 = vld [vmem:[%s4302_s7 + $0x1] sm:$0x7]  ;;  %v3673_v61 = vld [vmem:[#allocation7 + $0x8] sm:$0xff] }
  0x95   :  { %2983 = vmatpush3.bf16.msra.mxu0 %v2980_v41  ;;  %3013 = vmatprep.subr.bf16.mxu1 %v3012_v56  ;;  %v3664_v54 = vld [vmem:[#allocation7] sm:$0xff]  ;;  %v3675_v63 = vld [vmem:[#allocation7 + $0x10] sm:$0xff]  ;;  %v3690_v8 = vld [vmem:[#allocation7 + $0x18] sm:$0xff]  ;;  %v299_v11 = vsub.s32 2, %v290_v47 }
  0x96   :  { %2985 = vmatprep.subr.bf16.mxu0 %v2984_v50  ;;  %v3662_v51 = vrot.slane %v126_v49, %v291_v48  ;;  %v3702_v17 = vld [vmem:[#allocation7 + $0x28] sm:$0xff]  ;;  %v3717_v27 = vld [vmem:[#allocation7 + $0x38] sm:$0xff]  ;;  %v770_v34 = vld [vmem:[#allocation5] sm:$0xff] }
  0x97   :  { %v3709_v21 = vrot.slane %v126_v49, %v299_v11 }
  0x98   :  { %3015 = vmatpush1.bf16.msra.mxu1 %v3014_v0 }
  0x99   :  { %2987 = vmatpush3.bf16.msra.mxu0 %v2984_v50  ;;  %3017 = vmatprep.subr.bf16.mxu1 %v3016_v1  ;;  %v295_v50 = vsub.s32 1, %v290_v47 }
  0x9a   :  { %2989 = vmatprep.subr.bf16.mxu0 %v2988_v59 }
  0x9b   :  { %v296_v52 = vrot.slane %v126_v49, %v295_v50 }
  0x9c   :  { %3019 = vmatpush1.bf16.msra.mxu1 %v3018_v9 }
  0x9d   :  { %2991 = vmatpush3.bf16.msra.mxu0 %v2988_v59  ;;  %3021 = vmatprep.subr.bf16.mxu1 %v3020_v15 }
  0x9e   :  { %3025 = vmatprep.subr.bf16.mxu0 %v3024_v4 }
  0xa0   :  { %2709 = vmatmul.mubr.f32.vlgmr.msra.gmra.mrb[0].mxu0 %v130_v10  ;;  %3023 = vmatpush1.bf16.msra.mxu1 %v3022_v18  ;;  %v3692_v10 = vld [vmem:[#allocation7 + $0x20] sm:$0xff] }
  0xa1   :  { %2711 = vmatprep.mubr.f32.mxu0 %v131_v13  ;;  %3027 = vmatpush3.bf16.msra.mxu0 %v3024_v4 }
  0xa2   :  { %3029 = vmatprep.subr.bf16.mxu0 %v3028_v14  ;;  %2752 = vmatprep.subr.mxu1 %v3485_v36 }
  0xa4   :  { %2712 = vmatmul.mubr.f32.gmra.mrb[2].mxu0 %v132_v19 }
  0xa5   :  { %3031 = vmatpush3.bf16.msra.mxu0 %v3028_v14 }
  0xa6   :  { %3033 = vmatprep.subr.bf16.mxu0 %v3032_v20 }
  0xa9   :  { %3035 = vmatpush3.bf16.msra.mxu0 %v3032_v20  ;;  %v3707_v20 = vld [vmem:[#allocation7 + $0x30] sm:$0xff] }
  0xaa   :  { %3037 = vmatprep.subr.bf16.mxu0 %v3036_v23 }
  0xad   :  { %3039 = vmatpush3.bf16.msra.mxu0 %v3036_v23 }
  0xae   :  { %3041 = vmatprep.subr.bf16.mxu0 %v3040_v26 }
  0xb1   :  { %3043 = vmatpush3.bf16.msra.mxu0 %v3040_v26 }
  0xb2   :  { %3045 = vmatprep.subr.bf16.mxu0 %v3044_v29 }
  0xb5   :  { %3047 = vmatpush3.bf16.msra.mxu0 %v3044_v29 }
  0xb6   :  { %3049 = vmatprep.subr.bf16.mxu0 %v3048_v32 }
  0xb9   :  { %3051 = vmatpush3.bf16.msra.mxu0 %v3048_v32 }
  0xba   :  { %3053 = vmatprep.subr.bf16.mxu0 %v3052_v35 }
  0xbd   :  { %3055 = vmatpush3.bf16.msra.mxu0 %v3052_v35 }
 0x173   :  { %v2710_v38 = vpop.f32.mrb[0].mxu0 }
 0x174   :  { %v221_v39 = vpop.f32.mrb[1].mxu0  ;;  %v227_v41 = vadd.f32 %v2710_v38, %v2481_v37 }
 0x175   :  { %v222_v40 = vadd.f32 %v2481_v37, %v221_v39 }
 0x177   :  { %369 = vmatmul.mubr.f32.vlgmr.msra.gmra.mrb[0].mxu1 %v222_v40  ;;  %2746 = vmatprep.mubr.f32.mxu0 %v222_v40  ;;  %v2713_v42 = vpop.f32.mrb[2].mxu0 }
 0x178   :  { %2753 = vmatpush3.xpose.msra.mxu1 %v222_v40  ;;  %v237_v43 = vadd.f32 %v2713_v42, %v2481_v37  ;;  %2747 = vmatmul.mubr.f32.vlgmr.msra.gmra.mrb[4].mxu0 %v227_v41  ;;  %v231_v44 = vpop.f32.mrb[3].mxu0 }
 0x179   :  { %v232_v45 = vadd.f32 %v2481_v37, %v231_v44  ;;  %374 = vmatprep.mubr.f32.mxu1 %v3485_v36  ;;  %2757 = vmatprep.subr.mxu1 %v3485_v36 }
 0x17b   :  { %375 = vmatmul.mubr.f32.gmra.mrb[2].mxu1 %v227_v41  ;;  %2749 = vmatprep.mubr.f32.mxu0 %v232_v45 }
 0x17c   :  { %2750 = vmatmul.mubr.f32.gmra.mrb[6].mxu0 %v237_v43  ;;  %380 = vmatprep.mubr.f32.mxu1 %v3485_v36 }
 0x17f   :  { %381 = vmatmul.mubr.f32.gmra.mrb[4].mxu1 %v232_v45 }
 0x180   :  { %386 = vmatprep.mubr.f32.mxu1 %v3485_v36 }
 0x183   :  { %387 = vmatmul.mubr.f32.gmra.mrb[6].mxu1 %v237_v43 }
 0x184   :  { %2754 = vmatprep.mubr.msk.f32.mxu1 %vm3486_vm0, %v3485_v36 }
 0x187   :  { %2755 = vmatmul.mubr.f32.vlgmr.msra.gmra.mrb[8].mxu1 %v222_v40 }
 0x188   :  { %2758 = vmatpush3.xpose.msra.mxu1 %v227_v41  ;;  %2759 = vmatprep.mubr.msk.f32.mxu1 %vm3486_vm0, %v3485_v36 }
 0x189   :  { %2762 = vmatprep.subr.mxu1 %v3485_v36 }
 0x18b   :  { %2760 = vmatmul.mubr.f32.vlgmr.msra.gmra.mrb[10].mxu1 %v227_v41 }
 0x18c   :  { %2763 = vmatpush3.xpose.msra.mxu1 %v232_v45  ;;  %2764 = vmatprep.mubr.msk.f32.mxu1 %vm3486_vm0, %v3485_v36 }
 0x18d   :  { %2767 = vmatprep.subr.mxu1 %v3485_v36 }
 0x18f   :  { %2765 = vmatmul.mubr.f32.vlgmr.msra.gmra.mrb[12].mxu1 %v232_v45  ;;  %v771_v45 = vld [vmem:[#allocation5 + $0x8] sm:$0xff] }
 0x190   :  { %2768 = vmatpush3.xpose.msra.mxu1 %v237_v43  ;;  %2769 = vmatprep.mubr.msk.f32.mxu1 %vm3486_vm0, %v3485_v36 }
 0x193   :  { %2770 = vmatmul.mubr.f32.vlgmr.msra.gmra.mrb[14].mxu1 %v237_v43 }
 0x24a   :  { %v370_v53 = vpop.f32.mrb[0].mxu1 }
 0x24b   :  { %v3667_v55 = vadd.f32 %v370_v53, %v3662_v51  ;;  %v372_v56 = vpop.f32.mrb[1].mxu1  ;;  %v2748_v57 = vpop.f32.mrb[4].mxu0 }
 0x24c   :  { %v373_v58 = vadd.f32 %v372_v56, %v296_v52  ;;  %v3669_v59 = vpop.f32.mrb[5].mxu0  ;;  %v465_v31 = vadd.f32 %v2748_v57, %v3709_v21 }
 0x24d   :  { %v831_v60 = vmul.f32 %v3664_v54, %v3667_v55  ;;  %v832_v5 = vmul.f32 %v3673_v61, %v3667_v55  ;;  %v833_v6 = vmul.f32 %v3675_v63, %v3667_v55  ;;  %v834_v14 = vmul.f32 %v3690_v8, %v3667_v55 }
 0x24e   :  { %v376_v62 = vpop.f32.mrb[2].mxu1  ;;  %2772 = vmatprep.subr.mxu1 %v373_v58  ;;  %v835_v16 = vmul.f32 %v3692_v10, %v3667_v55  ;;  %v836_v24 = vmul.f32 %v3702_v17, %v3667_v55  ;;  %v837_v26 = vmul.f32 %v3707_v20, %v3667_v55  ;;  %v838_v35 = vmul.f32 %v3717_v27, %v3667_v55 }
 0x24f   :  { %v3678_v0 = vadd.f32 %v376_v62, %v3662_v51  ;;  %v378_v1 = vpop.f32.mrb[3].mxu1  ;;  %2773 = vmatpush3.xpose.msra.mxu1 %v373_v58  ;;  %2774 = vmatprep.mubr.f32.mxu1 %v831_v60  ;;  %v3680_v2 = vpop.f32.mrb[6].mxu0  ;;  %v460_v53 = vadd.f32 %v3669_v59, %v3709_v21  ;;  %v772_v58 = vld [vmem:[#allocation5 + $0x10] sm:$0xff] }
 0x250   :  { %v379_v3 = vadd.f32 %v378_v1, %v296_v52  ;;  %v3682_v4 = vpop.f32.mrb[7].mxu0  ;;  %v3755_v60 = vadd.f32 %v3680_v2, %v3709_v21 }
 0x251   :  { %v839_v7 = vmul.f32 %v3664_v54, %v3678_v0  ;;  %v840_v15 = vmul.f32 %v3673_v61, %v3678_v0  ;;  %v841_v19 = vmul.f32 %v3675_v63, %v3678_v0  ;;  %v842_v25 = vmul.f32 %v3690_v8, %v3678_v0 }
 0x252   :  { %v382_v9 = vpop.f32.mrb[4].mxu1  ;;  %2775 = vmatmul.mubr.f32.vlgmr.msra.gmra.mrb[16].mxu1 %v832_v5  ;;  %2786 = vmatprep.subr.mxu0 %v379_v3  ;;  %v843_v30 = vmul.f32 %v3692_v10, %v3678_v0  ;;  %v844_v36 = vmul.f32 %v3702_v17, %v3678_v0  ;;  %v845_v37 = vmul.f32 %v3707_v20, %v3678_v0 }
 0x253   :  { %3120 = vmatprep.subr.mxu1 %v379_v3  ;;  %v384_v12 = vpop.f32.mrb[5].mxu1  ;;  %2777 = vmatprep.mubr.f32.mxu1 %v833_v6  ;;  %v3732_v39 = vadd.f32 %v382_v9, %v3662_v51  ;;  %v846_v47 = vmul.f32 %v3717_v27, %v3678_v0  ;;  %v3768_v5 = vadd.f32 %v3682_v4, %v3709_v21  ;;  %v773_v9 = vld [vmem:[#allocation5 + $0x18] sm:$0xff] }
 0x254   :  { %v3694_v13 = vadd.f32 %v384_v12, %v296_v52  ;;  %2787 = vmatpush3.xpose.msra.mxu0 %v379_v3  ;;  %3121 = vmatpush3.xpose.msra.mxu1 %v379_v3 }
 0x255   :  { %2788 = vmatprep.mubr.f32.mxu0 %v839_v7  ;;  %v848_v59 = vmul.f32 %v3673_v61, %v3732_v39  ;;  %v849_v2 = vmul.f32 %v3675_v63, %v3732_v39 }
 0x256   :  { %v388_v18 = vpop.f32.mrb[6].mxu1  ;;  %2778 = vmatmul.mubr.f32.gmra.mrb[18].mxu1 %v834_v14  ;;  %2800 = vmatprep.subr.mxu1 %v3694_v13 }
 0x257   :  { %2789 = vmatmul.mubr.f32.vlgmr.msra.gmra.mrb[8].mxu0 %v840_v15  ;;  %v390_v22 = vpop.f32.mrb[7].mxu1  ;;  %2780 = vmatprep.mubr.f32.mxu1 %v835_v16  ;;  %v3720_v28 = vadd.f32 %v388_v18, %v3662_v51  ;;  %v847_v51 = vmul.f32 %v3664_v54, %v3732_v39 }
 0x258   :  { %v391_v23 = vadd.f32 %v390_v22, %v296_v52  ;;  %2791 = vmatprep.mubr.f32.mxu0 %v841_v19  ;;  %v854_v19 = vmul.f32 %v3717_v27, %v3732_v39 }
 0x259   :  { %v855_v41 = vmul.f32 %v3664_v54, %v3720_v28  ;;  %v856_v48 = vmul.f32 %v3673_v61, %v3720_v28  ;;  %v857_v57 = vmul.f32 %v3675_v63, %v3720_v28  ;;  %v858_v62 = vmul.f32 %v3690_v8, %v3720_v28 }
 0x25a   :  { %v544_v29 = vpop.f32.mrb[8].mxu1  ;;  %2781 = vmatmul.mubr.f32.gmra.mrb[20].mxu1 %v836_v24  ;;  %2814 = vmatprep.subr.mxu0 %v391_v23  ;;  %v859_v7 = vmul.f32 %v3692_v10, %v3720_v28  ;;  %v850_v63 = vmul.f32 %v3690_v8, %v3732_v39  ;;  %v860_v4 = vmul.f32 %v3702_v17, %v3720_v28 }
 0x25b   :  { %vm758_vm1 = vcmp.gt.f32.partialorder %v544_v29, 0.0  ;;  %v762_v32 = vmul.f32 0.2, %v544_v29  ;;  %2792 = vmatmul.mubr.f32.gmra.mrb[10].mxu0 %v842_v25  ;;  %v2756_v33 = vpop.f32.mrb[9].mxu1  ;;  %2783 = vmatprep.mubr.f32.mxu1 %v837_v26  ;;  %v861_v14 = vmul.f32 %v3707_v20, %v3720_v28  ;;  %v852_v8 = vmul.f32 %v3702_v17, %v3732_v39 }
 0x25c   :  { %2794 = vmatprep.mubr.f32.mxu0 %v843_v30  ;;  %2815 = vmatpush3.xpose.msra.mxu0 %v391_v23  ;;  %v862_v18 = vmul.f32 %v3717_v27, %v3720_v28 }
 0x25d   :  { %2842 = vmatprep.subr.mxu0 %v465_v31  ;;  %v766_v38 = vsel %vm758_vm1, %v544_v29, %v762_v32 }
 0x25e   :  { %v614_v40 = vpop.f32.mrb[10].mxu1  ;;  %2784 = vmatmul.mubr.f32.gmra.mrb[22].mxu1 %v838_v35  ;;  %v3736_v42 = vmul.f32 %v770_v34, %v766_v38 }
 0x25f   :  { %vm759_vm3 = vcmp.gt.f32.partialorder %v614_v40, 0.0  ;;  %v763_v43 = vmul.f32 0.2, %v614_v40  ;;  %2795 = vmatmul.mubr.f32.gmra.mrb[12].mxu0 %v844_v36  ;;  %v2761_v44 = vpop.f32.mrb[11].mxu1  ;;  %2797 = vmatprep.mubr.f32.mxu1 %v845_v37 }
 0x260   :  { %2816 = vmatprep.mubr.f32.mxu0 %v855_v41  ;;  %v779_v46 = vsel %vm778_vm2, %v3736_v42, -inf }
 0x261   :  { %780 = vmax.xlane.f32.xlu0 %v779_v46  ;;  %v767_v49 = vsel %vm759_vm3, %v614_v40, %v763_v43 }
 0x262   :  { %v684_v50 = vpop.f32.mrb[12].mxu1  ;;  %2798 = vmatmul.mubr.f32.vlgmr.msra.gmra.mrb[24].mxu1 %v846_v47  ;;  %v3746_v52 = vmul.f32 %v771_v45, %v767_v49 }
 0x263   :  { %vm760_vm4 = vcmp.gt.f32.partialorder %v684_v50, 0.0  ;;  %v764_v55 = vmul.f32 0.2, %v684_v50  ;;  %2801 = vmatpush3.xpose.msra.mxu1 %v3694_v13  ;;  %2817 = vmatmul.mubr.f32.vlgmr.msra.gmra.mrb[14].mxu0 %v856_v48  ;;  %v2766_v56 = vpop.f32.mrb[13].mxu1  ;;  %v851_v13 = vmul.f32 %v3692_v10, %v3732_v39  ;;  %v853_v10 = vmul.f32 %v3707_v20, %v3732_v39 }
 0x264   :  { %2843 = vmatpush3.msra.mxu0 %v465_v31  ;;  %2802 = vmatprep.mubr.f32.mxu1 %v847_v51  ;;  %v782_v54 = vsel %vm778_vm2, %v3746_v52, -inf }
 0x265   :  { %2819 = vmatprep.mubr.f32.mxu0 %v857_v57  ;;  %2828 = vmatprep.subr.mxu1 %v460_v53  ;;  %v768_v0 = vsel %vm760_vm4, %v684_v50, %v764_v55 }
 0x266   :  { %2870 = vmatprep.subr.mxu0 %v3755_v60  ;;  %783 = vmax.xlane.f32.xlu0 %v782_v54  ;;  %v754_v1 = vpop.f32.mrb[14].mxu1  ;;  %v776_v3 = vmul.f32 %v772_v58, %v768_v0 }
 0x267   :  { %vm761_vm5 = vcmp.gt.f32.partialorder %v754_v1, 0.0  ;;  %v765_v6 = vmul.f32 0.2, %v754_v1  ;;  %2803 = vmatmul.mubr.f32.vlgmr.msra.gmra.mrb[26].mxu1 %v848_v59  ;;  %2820 = vmatmul.mubr.f32.gmra.mrb[16].mxu0 %v858_v62  ;;  %v2771_v61 = vpop.f32.mrb[15].mxu1 }
 0x268   :  { %2829 = vmatpush3.msra.mxu1 %v460_v53  ;;  %2805 = vmatprep.mubr.f32.mxu1 %v849_v2  ;;  %v785_v11 = vsel %vm778_vm2, %v776_v3, -inf }
 0x269   :  { %2822 = vmatprep.mubr.f32.mxu0 %v859_v7  ;;  %2856 = vmatprep.subr.mxu1 %v3768_v5  ;;  %v769_v12 = vsel %vm761_vm5, %v754_v1, %v765_v6 }
 0x26a   :  { %786 = vmax.xlane.f32.xlu1 %v785_v11  ;;  %v777_v15 = vmul.f32 %v773_v9, %v769_v12 }
 0x26b   :  { %2806 = vmatmul.mubr.f32.gmra.mrb[28].mxu1 %v850_v63  ;;  %2823 = vmatmul.mubr.f32.gmra.mrb[18].mxu0 %v860_v4 }
 0x26c   :  { %2808 = vmatprep.mubr.f32.mxu1 %v851_v13  ;;  %2825 = vmatprep.mubr.f32.mxu0 %v861_v14  ;;  %v788_v16 = vsel %vm778_vm2, %v777_v15, -inf }
 0x26e   :  { %789 = vmax.xlane.f32.xlu1 %v788_v16 }
 0x26f   :  { %2809 = vmatmul.mubr.f32.gmra.mrb[30].mxu1 %v852_v8  ;;  %2826 = vmatmul.mubr.f32.gmra.mrb[20].mxu0 %v862_v18 }
 0x270   :  { %2811 = vmatprep.mubr.f32.mxu1 %v853_v10 }
 0x273   :  { %2812 = vmatmul.mubr.f32.gmra.mrb[32].mxu1 %v854_v19 }
 0x2ee   :  { %v781_v21 = vpop.xlane.xlu0 %780 }
 0x2ef   :  { %v791_v22 = vsub.f32 %v3736_v42, %v781_v21 }
 0x2f1   :  { %v795_v23 = vmul.f32 1.442695, %v791_v22 }
 0x2f3   :  { %3136 = vpow2.f32 %v795_v23  ;;  %v784_v17 = vpop.xlane.xlu0 %783 }
 0x2f4   :  { %v792_v24 = vsub.f32 %v3746_v52, %v784_v17 }
 0x2f6   :  { %v797_v25 = vmul.f32 1.442695, %v792_v24 }
 0x2f7   :  { %v787_v26 = vpop.xlane.xlu1 %786 }
 0x2f8   :  { %3138 = vpow2.f32 %v797_v25  ;;  %v793_v28 = vsub.f32 %v776_v3, %v787_v26 }
 0x2fa   :  { %v799_v20 = vmul.f32 1.442695, %v793_v28 }
 0x2fb   :  { %v790_v29 = vpop.xlane.xlu1 %789 }
 0x2fc   :  { %3140 = vpow2.f32 %v799_v20  ;;  %v794_v30 = vsub.f32 %v777_v15, %v790_v29 }
 0x2fd   :  { %v3137_v31 = vpop.eup %3136 }
 0x2fe   :  { %v801_v32 = vmul.f32 1.442695, %v794_v30  ;;  %v803_v27 = vsel %vm778_vm2, %v3137_v31, 0.0 }
 0x2ff   :  { %804 = vadd.xlane.f32.xlu0 %v803_v27 }
 0x300   :  { %3142 = vpow2.f32 %v801_v32 }
 0x302   :  { %v3794_v33 = vpop.eup %3138 }
 0x303   :  { %v806_v34 = vsel %vm778_vm2, %v3794_v33, 0.0 }
 0x304   :  { %807 = vadd.xlane.f32.xlu1 %v806_v34 }
 0x306   :  { %v3798_v35 = vpop.eup %3140 }
 0x307   :  { %v809_v36 = vsel %vm778_vm2, %v3798_v35, 0.0 }
 0x308   :  { %810 = vadd.xlane.f32.xlu0 %v809_v36 }
 0x30a   :  { %v3802_v37 = vpop.eup %3142 }
 0x30b   :  { %v812_v38 = vsel %vm778_vm2, %v3802_v37, 0.0 }
 0x30c   :  { %813 = vadd.xlane.f32.xlu1 %v812_v38 }
 0x325   :  { %v2776_v39 = vpop.f32.mrb[16].mxu1 }
 0x326   :  { %v929_v40 = vpop.f32.mrb[17].mxu1 }
 0x329   :  { %v2779_v41 = vpop.f32.mrb[18].mxu1 }
 0x32a   :  { %v2790_v42 = vpop.f32.mrb[8].mxu0  ;;  %v939_v43 = vpop.f32.mrb[19].mxu1 }
 0x32b   :  { %v1034_v44 = vpop.f32.mrb[9].mxu0 }
 0x32d   :  { %v2782_v45 = vpop.f32.mrb[20].mxu1 }
 0x32e   :  { %v3806_v46 = vpop.f32.mrb[10].mxu0  ;;  %v949_v47 = vpop.f32.mrb[21].mxu1 }
 0x32f   :  { %v1044_v48 = vpop.f32.mrb[11].mxu0 }
 0x331   :  { %v2785_v49 = vpop.f32.mrb[22].mxu1 }
 0x332   :  { %v3808_v50 = vpop.f32.mrb[12].mxu0  ;;  %v959_v51 = vpop.f32.mrb[23].mxu1 }
 0x333   :  { %v3810_v52 = vpop.f32.mrb[13].mxu0 }
 0x335   :  { %v3812_v53 = vpop.f32.mrb[24].mxu1 }
 0x336   :  { %v3814_v55 = vpop.f32.mrb[14].mxu0  ;;  %v3816_v56 = vpop.f32.mrb[25].mxu1 }
 0x337   :  { %v3818_v57 = vpop.f32.mrb[15].mxu0 }
 0x33a   :  { %v3820_v58 = vpop.f32.mrb[26].mxu1  ;;  %v3822_v54 = vpop.f32.mrb[16].mxu0 }
 0x33b   :  { %v3824_v59 = vpop.f32.mrb[27].mxu1  ;;  %v3826_v62 = vpop.f32.mrb[17].mxu0 }
 0x33e   :  { %v3828_v0 = vpop.f32.mrb[28].mxu1  ;;  %v3830_v1 = vpop.f32.mrb[18].mxu0 }
 0x33f   :  { %v3832_v2 = vpop.f32.mrb[29].mxu1  ;;  %v3834_v3 = vpop.f32.mrb[19].mxu0 }
 0x342   :  { %v3836_v6 = vpop.f32.mrb[30].mxu1  ;;  %v3838_v61 = vpop.f32.mrb[20].mxu0 }
 0x343   :  { %v3840_v7 = vpop.f32.mrb[31].mxu1  ;;  %v3842_v9 = vpop.f32.mrb[21].mxu0 }
 0x346   :  { %v3844_v11 = vpop.f32.mrb[32].mxu1 }
 0x347   :  { %v3846_v63 = vpop.f32.mrb[33].mxu1 }
 0x38c   :  { %v805_v4 = vpop.xlane.xlu0 %804 }
 0x38d   :  { %3144 = vrcp.f32 %v805_v4 }
 0x391   :  { %v808_v12 = vpop.xlane.xlu1 %807 }
 0x392   :  { %3146 = vrcp.f32 %v808_v12 }
 0x395   :  { %v811_v28 = vpop.xlane.xlu0 %810 }
 0x396   :  { %3148 = vrcp.f32 %v811_v28 }
 0x397   :  { %v3145_v13 = vpop.eup %3144 }
 0x398   :  { %v819_v14 = vmul.f32 %v3145_v13, %v3137_v31 }
 0x39a   :  { %v3848_v15 = vadd.f32 %v2776_v39, %v819_v14  ;;  %v3850_v16 = vadd.f32 %v929_v40, %v819_v14  ;;  %v3856_v10 = vadd.f32 %v2779_v41, %v819_v14  ;;  %v3858_v19 = vadd.f32 %v939_v43, %v819_v14 }
 0x39b   :  { %v3864_v23 = vadd.f32 %v2782_v45, %v819_v14  ;;  %v3866_v17 = vadd.f32 %v949_v47, %v819_v14  ;;  %v3868_v25 = vadd.f32 %v2785_v49, %v819_v14  ;;  %v3875_v30 = vadd.f32 %v959_v51, %v819_v14  ;;  %v814_v47 = vpop.xlane.xlu1 %813 }
 0x39c   :  { %v1318_v8 = vsel %vm778_vm2, %v3848_v15, -inf  ;;  %v1315_v18 = vsel %vm778_vm2, %v3850_v16, -inf  ;;  %v1324_v21 = vsel %vm778_vm2, %v3856_v10, -inf  ;;  %v1321_v22 = vsel %vm778_vm2, %v3858_v19, -inf  ;;  %v3147_v24 = vpop.eup %3146 }
 0x39d   :  { %1319 = vmax.xlane.f32.xlu1 %v1318_v8  ;;  %1316 = vmax.xlane.f32.xlu0 %v1315_v18  ;;  %v820_v26 = vmul.f32 %v3147_v24, %v3794_v33  ;;  %v1330_v20 = vsel %vm778_vm2, %v3864_v23, -inf  ;;  %v1327_v29 = vsel %vm778_vm2, %v3866_v17, -inf  ;;  %v1336_v31 = vsel %vm778_vm2, %v3868_v25, -inf }
 0x39e   :  { %v1333_v32 = vsel %vm778_vm2, %v3875_v30, -inf  ;;  %3150 = vrcp.f32 %v814_v47 }
 0x39f   :  { %v3881_v27 = vadd.f32 %v2790_v42, %v820_v26  ;;  %v3883_v33 = vadd.f32 %v1034_v44, %v820_v26  ;;  %v3890_v38 = vadd.f32 %v3806_v46, %v820_v26  ;;  %v3892_v39 = vadd.f32 %v1044_v48, %v820_v26 }
 0x3a0   :  { %v3899_v42 = vadd.f32 %v3808_v50, %v820_v26  ;;  %v3902_v43 = vadd.f32 %v3810_v52, %v820_v26  ;;  %v3149_v44 = vpop.eup %3148  ;;  %v3905_v45 = vadd.f32 %v3812_v53, %v820_v26  ;;  %v3913_v50 = vadd.f32 %v3816_v56, %v820_v26 }
 0x3a1   :  { %1325 = vmax.xlane.f32.xlu1 %v1324_v21  ;;  %1322 = vmax.xlane.f32.xlu0 %v1321_v22  ;;  %v1342_v34 = vsel %vm778_vm2, %v3881_v27, -inf  ;;  %v1339_v36 = vsel %vm778_vm2, %v3883_v33, -inf  ;;  %v1348_v40 = vsel %vm778_vm2, %v3890_v38, -inf  ;;  %v1345_v41 = vsel %vm778_vm2, %v3892_v39, -inf }
 0x3a2   :  { %v821_v46 = vmul.f32 %v3149_v44, %v3798_v35  ;;  %v1354_v48 = vsel %vm778_vm2, %v3899_v42, -inf  ;;  %v1351_v49 = vsel %vm778_vm2, %v3902_v43, -inf  ;;  %v1360_v51 = vsel %vm778_vm2, %v3905_v45, -inf }
 0x3a3   :  { %v1357_v52 = vsel %vm778_vm2, %v3913_v50, -inf }
 0x3a4   :  { %v3920_v35 = vadd.f32 %v3820_v58, %v821_v46  ;;  %v3923_v53 = vadd.f32 %v3824_v59, %v821_v46  ;;  %v3930_v12 = vadd.f32 %v3828_v0, %v821_v46  ;;  %v3933_v13 = vadd.f32 %v3832_v2, %v821_v46 }
 0x3a5   :  { %1331 = vmax.xlane.f32.xlu1 %v1330_v20  ;;  %1328 = vmax.xlane.f32.xlu0 %v1327_v29  ;;  %v3940_v14 = vadd.f32 %v3836_v6, %v821_v46  ;;  %v3943_v8 = vadd.f32 %v3840_v7, %v821_v46  ;;  %v3946_v0 = vadd.f32 %v3844_v11, %v821_v46 }
 0x3a6   :  { %v1366_v56 = vsel %vm778_vm2, %v3920_v35, -inf  ;;  %v1363_v4 = vsel %vm778_vm2, %v3923_v53, -inf  ;;  %v1372_v58 = vsel %vm778_vm2, %v3930_v12, -inf  ;;  %v1369_v59 = vsel %vm778_vm2, %v3933_v13, -inf }
 0x3a7   :  { %v1378_v21 = vsel %vm778_vm2, %v3940_v14, -inf  ;;  %v1375_v22 = vsel %vm778_vm2, %v3943_v8, -inf  ;;  %v3954_v6 = vadd.f32 %v3846_v63, %v821_v46  ;;  %v1384_v7 = vsel %vm778_vm2, %v3946_v0, -inf }
 0x3a8   :  { %v3151_v18 = vpop.eup %3150 }
 0x3a9   :  { %1337 = vmax.xlane.f32.xlu1 %v1336_v31  ;;  %1334 = vmax.xlane.f32.xlu0 %v1333_v32  ;;  %v822_v2 = vmul.f32 %v3151_v18, %v3802_v37  ;;  %v1381_v11 = vsel %vm778_vm2, %v3954_v6, -inf }
 0x3ab   :  { %v3961_v24 = vadd.f32 %v3814_v55, %v822_v2  ;;  %v3964_v37 = vadd.f32 %v3818_v57, %v822_v2  ;;  %v3971_v28 = vadd.f32 %v3822_v54, %v822_v2  ;;  %v3974_v20 = vadd.f32 %v3826_v62, %v822_v2 }
 0x3ac   :  { %v3981_v29 = vadd.f32 %v3830_v1, %v822_v2  ;;  %v3984_v31 = vadd.f32 %v3834_v3, %v822_v2  ;;  %v3991_v32 = vadd.f32 %v3838_v61, %v822_v2 }
 0x3ad   :  { %1343 = vmax.xlane.f32.xlu1 %v1342_v34  ;;  %1340 = vmax.xlane.f32.xlu0 %v1339_v36  ;;  %v1390_v63 = vsel %vm778_vm2, %v3961_v24, -inf  ;;  %v1387_v26 = vsel %vm778_vm2, %v3964_v37, -inf  ;;  %v1396_v55 = vsel %vm778_vm2, %v3971_v28, -inf  ;;  %v1393_v57 = vsel %vm778_vm2, %v3974_v20, -inf }
 0x3ae   :  { %v1402_v54 = vsel %vm778_vm2, %v3981_v29, -inf  ;;  %v1399_v62 = vsel %vm778_vm2, %v3984_v31, -inf  ;;  %v3994_v34 = vadd.f32 %v3842_v9, %v822_v2  ;;  %v1408_v1 = vsel %vm778_vm2, %v3991_v32, -inf }
 0x3b0   :  { %v1405_v3 = vsel %vm778_vm2, %v3994_v34, -inf }
 0x3b1   :  { %1349 = vmax.xlane.f32.xlu1 %v1348_v40  ;;  %1346 = vmax.xlane.f32.xlu0 %v1345_v41 }
 0x3b5   :  { %1355 = vmax.xlane.f32.xlu1 %v1354_v48  ;;  %1352 = vmax.xlane.f32.xlu0 %v1351_v49 }
 0x3b9   :  { %1361 = vmax.xlane.f32.xlu1 %v1360_v51  ;;  %1358 = vmax.xlane.f32.xlu0 %v1357_v52 }
 0x3bd   :  { %1367 = vmax.xlane.f32.xlu1 %v1366_v56  ;;  %1364 = vmax.xlane.f32.xlu0 %v1363_v4 }
 0x3c1   :  { %1373 = vmax.xlane.f32.xlu1 %v1372_v58  ;;  %1370 = vmax.xlane.f32.xlu0 %v1369_v59 }
 0x3c5   :  { %1379 = vmax.xlane.f32.xlu1 %v1378_v21  ;;  %1376 = vmax.xlane.f32.xlu0 %v1375_v22 }
 0x3c9   :  { %1385 = vmax.xlane.f32.xlu1 %v1384_v7  ;;  %1382 = vmax.xlane.f32.xlu0 %v1381_v11 }
 0x3cd   :  { %1391 = vmax.xlane.f32.xlu1 %v1390_v63  ;;  %1388 = vmax.xlane.f32.xlu0 %v1387_v26 }
 0x3d1   :  { %1397 = vmax.xlane.f32.xlu1 %v1396_v55  ;;  %1394 = vmax.xlane.f32.xlu0 %v1393_v57 }
 0x3d5   :  { %1403 = vmax.xlane.f32.xlu1 %v1402_v54  ;;  %1400 = vmax.xlane.f32.xlu0 %v1399_v62 }
 0x3d9   :  { %1409 = vmax.xlane.f32.xlu1 %v1408_v1  ;;  %1406 = vmax.xlane.f32.xlu0 %v1405_v3 }
 0x42a   :  { %v1320_v36 = vpop.xlane.xlu1 %1319  ;;  %v1317_v40 = vpop.xlane.xlu0 %1316 }
 0x42b   :  { %v1412_v41 = vsub.f32 %v3848_v15, %v1320_v36  ;;  %v1411_v61 = vsub.f32 %v3850_v16, %v1317_v40 }
 0x42d   :  { %v1445_v44 = vmul.f32 1.442695, %v1412_v41  ;;  %v1443_v46 = vmul.f32 1.442695, %v1411_v61 }
 0x42e   :  { %v1326_v9 = vpop.xlane.xlu1 %1325  ;;  %v1323_v47 = vpop.xlane.xlu0 %1322 }
 0x42f   :  { %3152 = vpow2.f32 %v1445_v44  ;;  %v1414_v48 = vsub.f32 %v3856_v10, %v1326_v9  ;;  %v1413_v49 = vsub.f32 %v3858_v19, %v1323_v47 }
 0x430   :  { %3154 = vpow2.f32 %v1443_v46 }
 0x431   :  { %v1449_v51 = vmul.f32 1.442695, %v1414_v48  ;;  %v1447_v52 = vmul.f32 1.442695, %v1413_v49 }
 0x432   :  { %v1332_v56 = vpop.xlane.xlu1 %1331  ;;  %v1329_v4 = vpop.xlane.xlu0 %1328 }
 0x433   :  { %3156 = vpow2.f32 %v1449_v51  ;;  %v1416_v58 = vsub.f32 %v3864_v23, %v1332_v56  ;;  %v1415_v15 = vsub.f32 %v3866_v17, %v1329_v4 }
 0x434   :  { %3158 = vpow2.f32 %v1447_v52 }
 0x435   :  { %v1453_v16 = vmul.f32 1.442695, %v1416_v58  ;;  %v1451_v59 = vmul.f32 1.442695, %v1415_v15 }
 0x436   :  { %v1338_v18 = vpop.xlane.xlu1 %1337  ;;  %v1335_v2 = vpop.xlane.xlu0 %1334 }
 0x437   :  { %3160 = vpow2.f32 %v1453_v16  ;;  %v1418_v10 = vsub.f32 %v3868_v25, %v1338_v18  ;;  %v1417_v19 = vsub.f32 %v3875_v30, %v1335_v2 }
 0x438   :  { %3162 = vpow2.f32 %v1451_v59 }
 0x439   :  { %v4008_v21 = vpop.eup %3152  ;;  %v1457_v22 = vmul.f32 1.442695, %v1418_v10  ;;  %v1455_v7 = vmul.f32 1.442695, %v1417_v19 }
 0x43a   :  { %v4010_v11 = vpop.eup %3154  ;;  %v1344_v23 = vpop.xlane.xlu1 %1343  ;;  %v1510_v17 = vsel %vm778_vm2, %v4008_v21, 0.0 }
 0x43b   :  { %v1341_v63 = vpop.xlane.xlu0 %1340  ;;  %3164 = vpow2.f32 %v1457_v22  ;;  %v1420_v26 = vsub.f32 %v3881_v27, %v1344_v23  ;;  %1511 = vadd.xlane.f32.xlu1 %v1510_v17  ;;  %v1507_v25 = vsel %vm778_vm2, %v4010_v11, 0.0 }
 0x43c   :  { %v1419_v55 = vsub.f32 %v3883_v33, %v1341_v63  ;;  %3166 = vpow2.f32 %v1455_v7  ;;  %1508 = vadd.xlane.f32.xlu0 %v1507_v25 }
 0x43d   :  { %v4018_v30 = vpop.eup %3156  ;;  %v1461_v57 = vmul.f32 1.442695, %v1420_v26 }
 0x43e   :  { %v1459_v54 = vmul.f32 1.442695, %v1419_v55  ;;  %v4020_v62 = vpop.eup %3158  ;;  %v1350_v1 = vpop.xlane.xlu1 %1349  ;;  %v1516_v36 = vsel %vm778_vm2, %v4018_v30, 0.0 }
 0x43f   :  { %v1347_v3 = vpop.xlane.xlu0 %1346  ;;  %3168 = vpow2.f32 %v1461_v57  ;;  %v1422_v27 = vsub.f32 %v3890_v38, %v1350_v1  ;;  %1517 = vadd.xlane.f32.xlu1 %v1516_v36  ;;  %v1513_v40 = vsel %vm778_vm2, %v4020_v62, 0.0 }
 0x440   :  { %v1421_v33 = vsub.f32 %v3892_v39, %v1347_v3  ;;  %3170 = vpow2.f32 %v1459_v54  ;;  %1514 = vadd.xlane.f32.xlu0 %v1513_v40 }
 0x441   :  { %v4028_v41 = vpop.eup %3160  ;;  %v1465_v61 = vmul.f32 1.442695, %v1422_v27 }
 0x442   :  { %v1463_v44 = vmul.f32 1.442695, %v1421_v33  ;;  %v4030_v46 = vpop.eup %3162  ;;  %v1356_v9 = vpop.xlane.xlu1 %1355  ;;  %v1522_v48 = vsel %vm778_vm2, %v4028_v41, 0.0 }
 0x443   :  { %v1353_v47 = vpop.xlane.xlu0 %1352  ;;  %3172 = vpow2.f32 %v1465_v61  ;;  %v1424_v38 = vsub.f32 %v3899_v42, %v1356_v9  ;;  %1523 = vadd.xlane.f32.xlu1 %v1522_v48  ;;  %v1519_v49 = vsel %vm778_vm2, %v4030_v46, 0.0 }
 0x444   :  { %v1423_v39 = vsub.f32 %v3902_v43, %v1353_v47  ;;  %3174 = vpow2.f32 %v1463_v44  ;;  %1520 = vadd.xlane.f32.xlu0 %v1519_v49 }
 0x445   :  { %v4038_v51 = vpop.eup %3164  ;;  %v1469_v52 = vmul.f32 1.442695, %v1424_v38 }
 0x446   :  { %v1467_v56 = vmul.f32 1.442695, %v1423_v39  ;;  %v4040_v4 = vpop.eup %3166  ;;  %v1362_v58 = vpop.xlane.xlu1 %1361  ;;  %v1528_v16 = vsel %vm778_vm2, %v4038_v51, 0.0 }
 0x447   :  { %v1359_v15 = vpop.xlane.xlu0 %1358  ;;  %3176 = vpow2.f32 %v1469_v52  ;;  %v1426_v42 = vsub.f32 %v3905_v45, %v1362_v58  ;;  %1529 = vadd.xlane.f32.xlu1 %v1528_v16  ;;  %v1525_v59 = vsel %vm778_vm2, %v4040_v4, 0.0 }
 0x448   :  { %v1425_v43 = vsub.f32 %v3913_v50, %v1359_v15  ;;  %3178 = vpow2.f32 %v1467_v56  ;;  %1526 = vadd.xlane.f32.xlu0 %v1525_v59 }
 0x449   :  { %v4048_v18 = vpop.eup %3168  ;;  %v1473_v2 = vmul.f32 1.442695, %v1426_v42 }
 0x44a   :  { %v1471_v10 = vmul.f32 1.442695, %v1425_v43  ;;  %v4050_v19 = vpop.eup %3170  ;;  %v1368_v22 = vpop.xlane.xlu1 %1367  ;;  %v1534_v23 = vsel %vm778_vm2, %v4048_v18, 0.0 }
 0x44b   :  { %v1365_v7 = vpop.xlane.xlu0 %1364  ;;  %3180 = vpow2.f32 %v1473_v2  ;;  %v1428_v45 = vsub.f32 %v3920_v35, %v1368_v22  ;;  %1535 = vadd.xlane.f32.xlu1 %v1534_v23  ;;  %v1531_v63 = vsel %vm778_vm2, %v4050_v19, 0.0 }
 0x44c   :  { %v1427_v50 = vsub.f32 %v3923_v53, %v1365_v7  ;;  %3182 = vpow2.f32 %v1471_v10  ;;  %1532 = vadd.xlane.f32.xlu0 %v1531_v63 }
 0x44d   :  { %v4058_v17 = vpop.eup %3172  ;;  %v1477_v26 = vmul.f32 1.442695, %v1428_v45 }
 0x44e   :  { %v1475_v55 = vmul.f32 1.442695, %v1427_v50  ;;  %v4060_v25 = vpop.eup %3174  ;;  %v1374_v57 = vpop.xlane.xlu1 %1373  ;;  %v1540_v1 = vsel %vm778_vm2, %v4058_v17, 0.0 }
 0x44f   :  { %v1371_v54 = vpop.xlane.xlu0 %1370  ;;  %3184 = vpow2.f32 %v1477_v26  ;;  %v1430_v35 = vsub.f32 %v3930_v12, %v1374_v57  ;;  %1541 = vadd.xlane.f32.xlu1 %v1540_v1  ;;  %v1537_v3 = vsel %vm778_vm2, %v4060_v25, 0.0 }
 0x450   :  { %v1429_v53 = vsub.f32 %v3933_v13, %v1371_v54  ;;  %3186 = vpow2.f32 %v1475_v55  ;;  %1538 = vadd.xlane.f32.xlu0 %v1537_v3 }
 0x451   :  { %v4068_v36 = vpop.eup %3176  ;;  %v1481_v27 = vmul.f32 1.442695, %v1430_v35 }
 0x452   :  { %v1479_v33 = vmul.f32 1.442695, %v1429_v53  ;;  %v4070_v40 = vpop.eup %3178  ;;  %v1380_v61 = vpop.xlane.xlu1 %1379  ;;  %v1546_v9 = vsel %vm778_vm2, %v4068_v36, 0.0 }
 0x453   :  { %v1377_v44 = vpop.xlane.xlu0 %1376  ;;  %3188 = vpow2.f32 %v1481_v27  ;;  %v1432_v12 = vsub.f32 %v3940_v14, %v1380_v61  ;;  %1547 = vadd.xlane.f32.xlu1 %v1546_v9  ;;  %v1543_v47 = vsel %vm778_vm2, %v4070_v40, 0.0 }
 0x454   :  { %v1431_v13 = vsub.f32 %v3943_v8, %v1377_v44  ;;  %3190 = vpow2.f32 %v1479_v33  ;;  %1544 = vadd.xlane.f32.xlu0 %v1543_v47 }
 0x455   :  { %v4078_v48 = vpop.eup %3180  ;;  %v1485_v38 = vmul.f32 1.442695, %v1432_v12 }
 0x456   :  { %v1483_v39 = vmul.f32 1.442695, %v1431_v13  ;;  %v4080_v49 = vpop.eup %3182  ;;  %v1386_v52 = vpop.xlane.xlu1 %1385  ;;  %v1552_v58 = vsel %vm778_vm2, %v4078_v48, 0.0 }
 0x457   :  { %v1383_v56 = vpop.xlane.xlu0 %1382  ;;  %3192 = vpow2.f32 %v1485_v38  ;;  %v1434_v14 = vsub.f32 %v3946_v0, %v1386_v52  ;;  %1553 = vadd.xlane.f32.xlu1 %v1552_v58  ;;  %v1549_v15 = vsel %vm778_vm2, %v4080_v49, 0.0 }
 0x458   :  { %v1433_v8 = vsub.f32 %v3954_v6, %v1383_v56  ;;  %3194 = vpow2.f32 %v1483_v39  ;;  %1550 = vadd.xlane.f32.xlu0 %v1549_v15 }
 0x459   :  { %v4088_v16 = vpop.eup %3184  ;;  %v1489_v42 = vmul.f32 1.442695, %v1434_v14 }
 0x45a   :  { %v1487_v43 = vmul.f32 1.442695, %v1433_v8  ;;  %v4090_v59 = vpop.eup %3186  ;;  %v1392_v2 = vpop.xlane.xlu1 %1391  ;;  %v1558_v22 = vsel %vm778_vm2, %v4088_v16, 0.0 }
 0x45b   :  { %v1389_v10 = vpop.xlane.xlu0 %1388  ;;  %3196 = vpow2.f32 %v1489_v42  ;;  %v1436_v0 = vsub.f32 %v3961_v24, %v1392_v2  ;;  %1559 = vadd.xlane.f32.xlu1 %v1558_v22  ;;  %v1555_v7 = vsel %vm778_vm2, %v4090_v59, 0.0 }
 0x45c   :  { %v1435_v6 = vsub.f32 %v3964_v37, %v1389_v10  ;;  %3198 = vpow2.f32 %v1487_v43  ;;  %1556 = vadd.xlane.f32.xlu0 %v1555_v7 }
 0x45d   :  { %v4098_v23 = vpop.eup %3188  ;;  %v1493_v45 = vmul.f32 1.442695, %v1436_v0 }
 0x45e   :  { %v1491_v50 = vmul.f32 1.442695, %v1435_v6  ;;  %v4100_v63 = vpop.eup %3190  ;;  %v1398_v26 = vpop.xlane.xlu1 %1397  ;;  %v1564_v57 = vsel %vm778_vm2, %v4098_v23, 0.0 }
 0x45f   :  { %v1395_v55 = vpop.xlane.xlu0 %1394  ;;  %3200 = vpow2.f32 %v1493_v45  ;;  %v1438_v24 = vsub.f32 %v3971_v28, %v1398_v26  ;;  %1565 = vadd.xlane.f32.xlu1 %v1564_v57  ;;  %v1561_v54 = vsel %vm778_vm2, %v4100_v63, 0.0 }
 0x460   :  { %v1437_v37 = vsub.f32 %v3974_v20, %v1395_v55  ;;  %3202 = vpow2.f32 %v1491_v50  ;;  %1562 = vadd.xlane.f32.xlu0 %v1561_v54 }
 0x461   :  { %v4108_v1 = vpop.eup %3192  ;;  %v1497_v35 = vmul.f32 1.442695, %v1438_v24 }
 0x462   :  { %v1495_v53 = vmul.f32 1.442695, %v1437_v37  ;;  %v4110_v3 = vpop.eup %3194  ;;  %v1404_v27 = vpop.xlane.xlu1 %1403  ;;  %v1570_v61 = vsel %vm778_vm2, %v4108_v1, 0.0 }
 0x463   :  { %v1401_v33 = vpop.xlane.xlu0 %1400  ;;  %3204 = vpow2.f32 %v1497_v35  ;;  %v1440_v28 = vsub.f32 %v3981_v29, %v1404_v27  ;;  %1571 = vadd.xlane.f32.xlu1 %v1570_v61  ;;  %v1567_v44 = vsel %vm778_vm2, %v4110_v3, 0.0 }
 0x464   :  { %v1439_v20 = vsub.f32 %v3984_v31, %v1401_v33  ;;  %3206 = vpow2.f32 %v1495_v53  ;;  %1568 = vadd.xlane.f32.xlu0 %v1567_v44 }
 0x465   :  { %v4118_v9 = vpop.eup %3196  ;;  %v1501_v12 = vmul.f32 1.442695, %v1440_v28 }
 0x466   :  { %v1499_v13 = vmul.f32 1.442695, %v1439_v20  ;;  %v4120_v47 = vpop.eup %3198  ;;  %v1410_v38 = vpop.xlane.xlu1 %1409  ;;  %v1576_v52 = vsel %vm778_vm2, %v4118_v9, 0.0 }
 0x467   :  { %v1407_v39 = vpop.xlane.xlu0 %1406  ;;  %3208 = vpow2.f32 %v1501_v12  ;;  %v1442_v29 = vsub.f32 %v3991_v32, %v1410_v38  ;;  %1577 = vadd.xlane.f32.xlu1 %v1576_v52  ;;  %v1573_v56 = vsel %vm778_vm2, %v4120_v47, 0.0 }
 0x468   :  { %v1441_v31 = vsub.f32 %v3994_v34, %v1407_v39  ;;  %3210 = vpow2.f32 %v1499_v13  ;;  %1574 = vadd.xlane.f32.xlu0 %v1573_v56 }
 0x469   :  { %v4128_v58 = vpop.eup %3200  ;;  %v1505_v14 = vmul.f32 1.442695, %v1442_v29 }
 0x46a   :  { %v1503_v8 = vmul.f32 1.442695, %v1441_v31  ;;  %v4130_v15 = vpop.eup %3202  ;;  %v1582_v42 = vsel %vm778_vm2, %v4128_v58, 0.0 }
 0x46b   :  { %3212 = vpow2.f32 %v1505_v14  ;;  %1583 = vadd.xlane.f32.xlu1 %v1582_v42  ;;  %v1579_v32 = vsel %vm778_vm2, %v4130_v15, 0.0 }
 0x46c   :  { %3214 = vpow2.f32 %v1503_v8  ;;  %1580 = vadd.xlane.f32.xlu0 %v1579_v32 }
 0x46d   :  { %v4136_v34 = vpop.eup %3204 }
 0x46e   :  { %v4138_v43 = vpop.eup %3206  ;;  %v1588_v2 = vsel %vm778_vm2, %v4136_v34, 0.0 }
 0x46f   :  { %1589 = vadd.xlane.f32.xlu1 %v1588_v2  ;;  %v1585_v10 = vsel %vm778_vm2, %v4138_v43, 0.0 }
 0x470   :  { %1586 = vadd.xlane.f32.xlu0 %v1585_v10 }
 0x471   :  { %v4144_v22 = vpop.eup %3208 }
 0x472   :  { %v4146_v0 = vpop.eup %3210  ;;  %v1594_v6 = vsel %vm778_vm2, %v4144_v22, 0.0 }
 0x473   :  { %1595 = vadd.xlane.f32.xlu1 %v1594_v6  ;;  %v1591_v7 = vsel %vm778_vm2, %v4146_v0, 0.0 }
 0x474   :  { %1592 = vadd.xlane.f32.xlu0 %v1591_v7 }
 0x475   :  { %v4152_v45 = vpop.eup %3212 }
 0x476   :  { %v4154_v50 = vpop.eup %3214  ;;  %v1600_v26 = vsel %vm778_vm2, %v4152_v45, 0.0 }
 0x477   :  { %1601 = vadd.xlane.f32.xlu1 %v1600_v26  ;;  %v1597_v55 = vsel %vm778_vm2, %v4154_v50, 0.0 }
 0x478   :  { %1598 = vadd.xlane.f32.xlu0 %v1597_v55 }
 0x4c8   :  { %v1512_v57 = vpop.xlane.xlu1 %1511 }
 0x4c9   :  { %3216 = vrcp.f32 %v1512_v57  ;;  %v1509_v24 = vpop.xlane.xlu0 %1508 }
 0x4ca   :  { %3218 = vrcp.f32 %v1509_v24 }
 0x4cc   :  { %v1518_v37 = vpop.xlane.xlu1 %1517 }
 0x4cd   :  { %3220 = vrcp.f32 %v1518_v37  ;;  %v1515_v54 = vpop.xlane.xlu0 %1514 }
 0x4ce   :  { %3222 = vrcp.f32 %v1515_v54 }
 0x4d0   :  { %v1524_v35 = vpop.xlane.xlu1 %1523 }
 0x4d1   :  { %3224 = vrcp.f32 %v1524_v35  ;;  %v1521_v53 = vpop.xlane.xlu0 %1520 }
 0x4d2   :  { %3226 = vrcp.f32 %v1521_v53 }
 0x4d3   :  { %v3217_v27 = vpop.eup %3216 }
 0x4d4   :  { %v3219_v33 = vpop.eup %3218  ;;  %v1636_v61 = vmul.f32 %v3217_v27, %v4008_v21  ;;  %v1530_v28 = vpop.xlane.xlu1 %1529 }
 0x4d5   :  { %3228 = vrcp.f32 %v1530_v28  ;;  %v1527_v20 = vpop.xlane.xlu0 %1526  ;;  %v1635_v44 = vmul.f32 %v3219_v33, %v4010_v11 }
 0x4d6   :  { %3230 = vrcp.f32 %v1527_v20 }
 0x4d7   :  { %v3221_v12 = vpop.eup %3220  ;;  %2830 = vmatprep.mubr.msk.f32.mxu1 %vm778_vm2, %v1635_v44 }
 0x4d8   :  { %v3223_v13 = vpop.eup %3222  ;;  %2831 = vmatmul.mubr.msk.f32.vlgmr.msra.gmra.mrb[34].mxu1 %vm778_vm2, %v1636_v61  ;;  %v1536_v38 = vpop.xlane.xlu1 %1535  ;;  %v1638_v39 = vmul.f32 %v3221_v12, %v4018_v30 }
 0x4d9   :  { %2857 = vmatpush3.msra.mxu1 %v3768_v5  ;;  %3232 = vrcp.f32 %v1536_v38  ;;  %v1533_v52 = vpop.xlane.xlu0 %1532  ;;  %v1637_v21 = vmul.f32 %v3223_v13, %v4020_v62 }
 0x4da   :  { %3234 = vrcp.f32 %v1533_v52 }
 0x4db   :  { %v3225_v29 = vpop.eup %3224  ;;  %2833 = vmatprep.mubr.msk.f32.mxu1 %vm778_vm2, %v1637_v21 }
 0x4dc   :  { %v3227_v11 = vpop.eup %3226  ;;  %2834 = vmatmul.mubr.msk.f32.gmra.mrb[36].mxu1 %vm778_vm2, %v1638_v39  ;;  %v1542_v31 = vpop.xlane.xlu1 %1541  ;;  %v1640_v56 = vmul.f32 %v3225_v29, %v4028_v41 }
 0x4dd   :  { %3236 = vrcp.f32 %v1542_v31  ;;  %v1539_v14 = vpop.xlane.xlu0 %1538  ;;  %v1639_v30 = vmul.f32 %v3227_v11, %v4030_v46 }
 0x4de   :  { %3238 = vrcp.f32 %v1539_v14 }
 0x4df   :  { %v3229_v5 = vpop.eup %3228  ;;  %2836 = vmatprep.mubr.msk.f32.mxu1 %vm778_vm2, %v1639_v30 }
 0x4e0   :  { %v3231_v8 = vpop.eup %3230  ;;  %2837 = vmatmul.mubr.msk.f32.gmra.mrb[38].mxu1 %vm778_vm2, %v1640_v56  ;;  %v1548_v62 = vpop.xlane.xlu1 %1547  ;;  %v1642_v42 = vmul.f32 %v3229_v5, %v4038_v51 }
 0x4e1   :  { %3240 = vrcp.f32 %v1548_v62  ;;  %v1545_v32 = vpop.xlane.xlu0 %1544  ;;  %v1641_v2 = vmul.f32 %v3231_v8, %v4040_v4 }
 0x4e2   :  { %3242 = vrcp.f32 %v1545_v32 }
 0x4e3   :  { %v3233_v41 = vpop.eup %3232  ;;  %2839 = vmatprep.mubr.msk.f32.mxu1 %vm778_vm2, %v1641_v2 }
 0x4e4   :  { %v3235_v10 = vpop.eup %3234  ;;  %v1644_v46 = vmul.f32 %v3233_v41, %v4048_v18  ;;  %2840 = vmatmul.mubr.msk.f32.gmra.mrb[40].mxu1 %vm778_vm2, %v1642_v42  ;;  %v1554_v6 = vpop.xlane.xlu1 %1553 }
 0x4e5   :  { %3244 = vrcp.f32 %v1554_v6  ;;  %v1551_v7 = vpop.xlane.xlu0 %1550  ;;  %v1643_v26 = vmul.f32 %v3235_v10, %v4050_v19 }
 0x4e6   :  { %3246 = vrcp.f32 %v1551_v7 }
 0x4e7   :  { %v3237_v51 = vpop.eup %3236  ;;  %2844 = vmatprep.mubr.msk.f32.mxu0 %vm778_vm2, %v1643_v26 }
 0x4e8   :  { %v3239_v55 = vpop.eup %3238  ;;  %2845 = vmatmul.mubr.msk.f32.vlgmr.msra.gmra.mrb[22].mxu0 %vm778_vm2, %v1644_v46  ;;  %v1560_v4 = vpop.xlane.xlu1 %1559  ;;  %v1646_v57 = vmul.f32 %v3237_v51, %v4058_v17  ;;  %v2243_v51 = vld [vmem:[#allocation11] sm:$0xff] }
 0x4e9   :  { %2871 = vmatpush3.msra.mxu0 %v3755_v60  ;;  %3248 = vrcp.f32 %v1560_v4  ;;  %v1557_v18 = vpop.xlane.xlu0 %1556  ;;  %v1645_v24 = vmul.f32 %v3239_v55, %v4060_v25  ;;  %v2244_v55 = vld [vmem:[#allocation11 + $0x8] sm:$0xff] }
 0x4ea   :  { %3250 = vrcp.f32 %v1557_v18  ;;  %v3056_v4 = vpack.c.bf16 %v2244_v55, %v2243_v51  ;;  %v2247_v18 = vld [vmem:[#allocation11 + $0x20] sm:$0xff]  ;;  %v4241_v51 = vld [vmem:[#allocation7 + $0x28] sm:$0xff] }
 0x4eb   :  { %v3241_v37 = vpop.eup %3240  ;;  %2847 = vmatprep.mubr.msk.f32.mxu0 %vm778_vm2, %v1645_v24  ;;  %v2248_v24 = vld [vmem:[#allocation11 + $0x28] sm:$0xff] }
 0x4ec   :  { %v3243_v19 = vpop.eup %3242  ;;  %2848 = vmatmul.mubr.msk.f32.gmra.mrb[24].mxu0 %vm778_vm2, %v1646_v57  ;;  %v1566_v54 = vpop.xlane.xlu1 %1565  ;;  %v1648_v35 = vmul.f32 %v3241_v37, %v4068_v36  ;;  %3057 = vmatprep.subr.bf16.mxu1 %v3056_v4  ;;  %v3064_v37 = vpack.c.bf16 %v2248_v24, %v2247_v18 }
 0x4ed   :  { %3252 = vrcp.f32 %v1566_v54  ;;  %v1563_v53 = vpop.xlane.xlu0 %1562  ;;  %v1647_v17 = vmul.f32 %v3243_v19, %v4070_v40  ;;  %v2251_v54 = vld [vmem:[#allocation11 + $0x40] sm:$0xff] }
 0x4ee   :  { %3254 = vrcp.f32 %v1563_v53 }
 0x4ef   :  { %v3245_v60 = vpop.eup %3244  ;;  %2850 = vmatprep.mubr.msk.f32.mxu0 %vm778_vm2, %v1647_v17  ;;  %v2253_v17 = vld [vmem:[#allocation11 + $0x50] sm:$0xff] }
 0x4f0   :  { %v3247_v27 = vpop.eup %3246  ;;  %2851 = vmatmul.mubr.msk.f32.gmra.mrb[26].mxu0 %vm778_vm2, %v1648_v35  ;;  %v1572_v25 = vpop.xlane.xlu1 %1571  ;;  %v1650_v33 = vmul.f32 %v3245_v60, %v4078_v48  ;;  %v2252_v35 = vld [vmem:[#allocation11 + $0x48] sm:$0xff]  ;;  %v2254_v60 = vld [vmem:[#allocation11 + $0x58] sm:$0xff] }
 0x4f1   :  { %3256 = vrcp.f32 %v1572_v25  ;;  %v1569_v61 = vpop.xlane.xlu0 %1568  ;;  %v1649_v28 = vmul.f32 %v3247_v27, %v4080_v49  ;;  %v3072_v53 = vpack.c.bf16 %v2252_v35, %v2251_v54  ;;  %v3076_v27 = vpack.c.bf16 %v2254_v60, %v2253_v17  ;;  %v2255_v25 = vld [vmem:[#allocation11 + $0x60] sm:$0xff] }
 0x4f2   :  { %3258 = vrcp.f32 %v1569_v61 }
 0x4f3   :  { %v3249_v36 = vpop.eup %3248  ;;  %2853 = vmatprep.mubr.msk.f32.mxu0 %vm778_vm2, %v1649_v28  ;;  %v2257_v28 = vld [vmem:[#allocation11 + $0x70] sm:$0xff] }
 0x4f4   :  { %v3251_v20 = vpop.eup %3250  ;;  %v1652_v40 = vmul.f32 %v3249_v36, %v4088_v16  ;;  %2854 = vmatmul.mubr.msk.f32.gmra.mrb[28].mxu0 %vm778_vm2, %v1650_v33  ;;  %v1578_v44 = vpop.xlane.xlu1 %1577  ;;  %v2256_v33 = vld [vmem:[#allocation11 + $0x68] sm:$0xff]  ;;  %v2258_v36 = vld [vmem:[#allocation11 + $0x78] sm:$0xff] }
 0x4f5   :  { %3260 = vrcp.f32 %v1578_v44  ;;  %v1575_v12 = vpop.xlane.xlu0 %1574  ;;  %v1651_v13 = vmul.f32 %v3251_v20, %v4090_v59  ;;  %v3080_v61 = vpack.c.bf16 %v2256_v33, %v2255_v25  ;;  %v3084_v20 = vpack.c.bf16 %v2258_v36, %v2257_v28  ;;  %v2351_v44 = vld [vmem:[#allocation13 + $0x8] sm:$0xff] }
 0x4f6   :  { %3262 = vrcp.f32 %v1575_v12  ;;  %v2352_v12 = vld [vmem:[#allocation13 + $0x10] sm:$0xff] }
 0x4f7   :  { %v3253_v48 = vpop.eup %3252  ;;  %2858 = vmatprep.mubr.msk.f32.mxu1 %vm778_vm2, %v1651_v13 }
 0x4f8   :  { %v3255_v38 = vpop.eup %3254  ;;  %2859 = vmatmul.mubr.msk.f32.vlgmr.msra.gmra.mrb[42].mxu1 %vm778_vm2, %v1652_v40  ;;  %v1584_v49 = vpop.xlane.xlu1 %1583  ;;  %v1654_v39 = vmul.f32 %v3253_v48, %v4098_v23  ;;  %v2350_v40 = vld [vmem:[#allocation13] sm:$0xff]  ;;  %v2353_v48 = vld [vmem:[#allocation13 + $0x18] sm:$0xff] }
 0x4f9   :  { %3264 = vrcp.f32 %v1584_v49  ;;  %v1581_v52 = vpop.xlane.xlu0 %1580  ;;  %v1653_v16 = vmul.f32 %v3255_v38, %v4100_v63  ;;  %3059 = vmatpush3.bf16.msra.mxu1 %v3056_v4  ;;  %v3088_v13 = vpack.c.bf16 %v2351_v44, %v2350_v40  ;;  %v3092_v38 = vpack.c.bf16 %v2353_v48, %v2352_v12  ;;  %v2354_v49 = vld [vmem:[#allocation13 + $0x20] sm:$0xff] }
 0x4fa   :  { %3266 = vrcp.f32 %v1581_v52 }
 0x4fb   :  { %v3257_v21 = vpop.eup %3256  ;;  %2861 = vmatprep.mubr.msk.f32.mxu1 %vm778_vm2, %v1653_v16  ;;  %3089 = vmatprep.subr.bf16.mxu0 %v3088_v13  ;;  %v2356_v16 = vld [vmem:[#allocation13 + $0x30] sm:$0xff] }
 0x4fc   :  { %v3259_v29 = vpop.eup %3258  ;;  %2862 = vmatmul.mubr.msk.f32.gmra.mrb[44].mxu1 %vm778_vm2, %v1654_v39  ;;  %v1590_v59 = vpop.xlane.xlu1 %1589  ;;  %v1656_v11 = vmul.f32 %v3257_v21, %v4108_v1  ;;  %v2355_v39 = vld [vmem:[#allocation13 + $0x28] sm:$0xff]  ;;  %v2357_v21 = vld [vmem:[#allocation13 + $0x38] sm:$0xff] }
 0x4fd   :  { %3268 = vrcp.f32 %v1590_v59  ;;  %v1587_v31 = vpop.xlane.xlu0 %1586  ;;  %v1655_v56 = vmul.f32 %v3259_v29, %v4110_v3  ;;  %v3096_v52 = vpack.c.bf16 %v2355_v39, %v2354_v49  ;;  %v3100_v29 = vpack.c.bf16 %v2357_v21, %v2356_v16  ;;  %v2358_v59 = vld [vmem:[#allocation13 + $0x40] sm:$0xff] }
 0x4fe   :  { %3270 = vrcp.f32 %v1587_v31 }
 0x4ff   :  { %v3261_v23 = vpop.eup %3260  ;;  %2864 = vmatprep.mubr.msk.f32.mxu1 %vm778_vm2, %v1655_v56  ;;  %v2360_v56 = vld [vmem:[#allocation13 + $0x50] sm:$0xff] }
 0x500   :  { %v3263_v14 = vpop.eup %3262  ;;  %2865 = vmatmul.mubr.msk.f32.gmra.mrb[46].mxu1 %vm778_vm2, %v1656_v11  ;;  %v1596_v63 = vpop.xlane.xlu1 %1595  ;;  %v1658_v30 = vmul.f32 %v3261_v23, %v4118_v9  ;;  %v2359_v11 = vld [vmem:[#allocation13 + $0x48] sm:$0xff]  ;;  %v2361_v23 = vld [vmem:[#allocation13 + $0x58] sm:$0xff] }
 0x501   :  { %3272 = vrcp.f32 %v1596_v63  ;;  %v1593_v5 = vpop.xlane.xlu0 %1592  ;;  %v1657_v8 = vmul.f32 %v3263_v14, %v4120_v47  ;;  %v3104_v31 = vpack.c.bf16 %v2359_v11, %v2358_v59  ;;  %v3108_v14 = vpack.c.bf16 %v2361_v23, %v2360_v56  ;;  %v2362_v63 = vld [vmem:[#allocation13 + $0x60] sm:$0xff] }
 0x502   :  { %3274 = vrcp.f32 %v1593_v5 }
 0x503   :  { %v3265_v1 = vpop.eup %3264  ;;  %2867 = vmatprep.mubr.msk.f32.mxu1 %vm778_vm2, %v1657_v8 }
 0x504   :  { %v3267_v62 = vpop.eup %3266  ;;  %v1660_v3 = vmul.f32 %v3265_v1, %v4128_v58  ;;  %2868 = vmatmul.mubr.msk.f32.gmra.mrb[48].mxu1 %vm778_vm2, %v1658_v30  ;;  %v1602_v42 = vpop.xlane.xlu1 %1601  ;;  %v2363_v30 = vld [vmem:[#allocation13 + $0x68] sm:$0xff] }
 0x505   :  { %3276 = vrcp.f32 %v1602_v42  ;;  %v1599_v32 = vpop.xlane.xlu0 %1598  ;;  %v1659_v2 = vmul.f32 %v3267_v62, %v4130_v15  ;;  %v3112_v5 = vpack.c.bf16 %v2363_v30, %v2362_v63  ;;  %v4226_v1 = vld [vmem:[#allocation7 + $0x8] sm:$0xff]  ;;  %v4229_v42 = vld [vmem:[#allocation7] sm:$0xff] }
 0x506   :  { %3278 = vrcp.f32 %v1599_v32 }
 0x507   :  { %v3269_v9 = vpop.eup %3268  ;;  %2872 = vmatprep.mubr.msk.f32.mxu0 %vm778_vm2, %v1659_v2 }
 0x508   :  { %v3271_v41 = vpop.eup %3270  ;;  %2873 = vmatmul.mubr.msk.f32.vlgmr.msra.gmra.mrb[30].mxu0 %vm778_vm2, %v1660_v3  ;;  %v1662_v47 = vmul.f32 %v3269_v9, %v4136_v34 }
 0x509   :  { %v1661_v10 = vmul.f32 %v3271_v41, %v4138_v43  ;;  %3091 = vmatpush3.bf16.msra.mxu0 %v3088_v13 }
 0x50a   :  { %3093 = vmatprep.subr.bf16.mxu0 %v3092_v38 }
 0x50b   :  { %v3273_v46 = vpop.eup %3272  ;;  %2875 = vmatprep.mubr.msk.f32.mxu0 %vm778_vm2, %v1661_v10 }
 0x50c   :  { %v3275_v58 = vpop.eup %3274  ;;  %2876 = vmatmul.mubr.msk.f32.gmra.mrb[32].mxu0 %vm778_vm2, %v1662_v47  ;;  %v1664_v6 = vmul.f32 %v3273_v46, %v4144_v22  ;;  %v2245_v22 = vld [vmem:[#allocation11 + $0x10] sm:$0xff]  ;;  %v4235_v46 = vld [vmem:[#allocation7 + $0x18] sm:$0xff] }
 0x50d   :  { %v1663_v15 = vmul.f32 %v3275_v58, %v4146_v0  ;;  %v2246_v0 = vld [vmem:[#allocation11 + $0x18] sm:$0xff]  ;;  %3095 = vmatpush3.bf16.msra.mxu0 %v3092_v38  ;;  %v4232_v47 = vld [vmem:[#allocation7 + $0x10] sm:$0xff] }
 0x50e   :  { %v3060_v57 = vpack.c.bf16 %v2246_v0, %v2245_v22  ;;  %3097 = vmatprep.subr.bf16.mxu0 %v3096_v52 }
 0x50f   :  { %v3277_v7 = vpop.eup %3276  ;;  %2878 = vmatprep.mubr.msk.f32.mxu0 %vm778_vm2, %v1663_v15 }
 0x510   :  { %v3279_v26 = vpop.eup %3278  ;;  %2879 = vmatmul.mubr.msk.f32.gmra.mrb[34].mxu0 %vm778_vm2, %v1664_v6  ;;  %v1666_v34 = vmul.f32 %v3277_v7, %v4152_v45  ;;  %3061 = vmatprep.subr.bf16.mxu1 %v3060_v57  ;;  %v2249_v45 = vld [vmem:[#allocation11 + $0x30] sm:$0xff] }
 0x511   :  { %v1665_v43 = vmul.f32 %v3279_v26, %v4154_v50  ;;  %3063 = vmatpush3.bf16.msra.mxu1 %v3060_v57  ;;  %v2250_v50 = vld [vmem:[#allocation11 + $0x38] sm:$0xff]  ;;  %3099 = vmatpush3.bf16.msra.mxu0 %v3096_v52  ;;  %v4238_v26 = vld [vmem:[#allocation7 + $0x20] sm:$0xff]  ;;  %v4244_v57 = vld [vmem:[#allocation7 + $0x30] sm:$0xff] }
 0x512   :  { %3065 = vmatprep.subr.bf16.mxu1 %v3064_v37  ;;  %v3068_v19 = vpack.c.bf16 %v2250_v50, %v2249_v45  ;;  %3101 = vmatprep.subr.bf16.mxu0 %v3100_v29 }
 0x513   :  { %2881 = vmatprep.mubr.msk.f32.mxu0 %vm778_vm2, %v1665_v43 }
 0x514   :  { %2882 = vmatmul.mubr.msk.f32.gmra.mrb[36].mxu0 %vm778_vm2, %v1666_v34 }
 0x515   :  { %3067 = vmatpush3.bf16.msra.mxu1 %v3064_v37  ;;  %3103 = vmatpush3.bf16.msra.mxu0 %v3100_v29  ;;  %v4247_v37 = vld [vmem:[#allocation7 + $0x38] sm:$0xff] }
 0x516   :  { %3069 = vmatprep.subr.bf16.mxu1 %v3068_v19  ;;  %3105 = vmatprep.subr.bf16.mxu0 %v3104_v31 }
 0x519   :  { %3071 = vmatpush3.bf16.msra.mxu1 %v3068_v19  ;;  %3107 = vmatpush3.bf16.msra.mxu0 %v3104_v31 }
 0x51a   :  { %3073 = vmatprep.subr.bf16.mxu1 %v3072_v53  ;;  %3109 = vmatprep.subr.bf16.mxu0 %v3108_v14 }
 0x51d   :  { %3075 = vmatpush3.bf16.msra.mxu1 %v3072_v53  ;;  %3111 = vmatpush3.bf16.msra.mxu0 %v3108_v14 }
 0x51e   :  { %3077 = vmatprep.subr.bf16.mxu1 %v3076_v27  ;;  %3113 = vmatprep.subr.bf16.mxu0 %v3112_v5 }
 0x521   :  { %3079 = vmatpush3.bf16.msra.mxu1 %v3076_v27  ;;  %3115 = vmatpush3.bf16.msra.mxu0 %v3112_v5 }
 0x522   :  { %3081 = vmatprep.subr.bf16.mxu1 %v3080_v61 }
 0x525   :  { %3083 = vmatpush3.bf16.msra.mxu1 %v3080_v61 }
 0x526   :  { %3085 = vmatprep.subr.bf16.mxu1 %v3084_v20 }
 0x529   :  { %3087 = vmatpush3.bf16.msra.mxu1 %v3084_v20 }
 0x5ab   :  { %v2832_v8 = vpop.f32.mrb[34].mxu1 }
 0x5ac   :  { %v2184_v62 = vmul.f32 %v4226_v1, %v2832_v8  ;;  %v1757_v3 = vpop.f32.mrb[35].mxu1 }
 0x5ad   :  { %v2183_v32 = vmul.f32 %v4229_v42, %v1757_v3 }
 0x5af   :  { %v2215_v2 = vadd.f32 %v2184_v62, %v2183_v32  ;;  %v2835_v9 = vpop.f32.mrb[36].mxu1 }
 0x5b0   :  { %v1767_v41 = vpop.f32.mrb[37].mxu1  ;;  %v2186_v58 = vmul.f32 %v4235_v46, %v2835_v9 }
 0x5b1   :  { %v2185_v10 = vmul.f32 %v4232_v47, %v1767_v41 }
 0x5b3   :  { %v2216_v6 = vadd.f32 %v2215_v2, %v2185_v10  ;;  %v2838_v15 = vpop.f32.mrb[38].mxu1 }
 0x5b4   :  { %v1777_v7 = vpop.f32.mrb[39].mxu1  ;;  %v2188_v55 = vmul.f32 %v4241_v51, %v2838_v15 }
 0x5b5   :  { %v2187_v34 = vmul.f32 %v4238_v26, %v1777_v7  ;;  %v2217_v43 = vadd.f32 %v2216_v6, %v2186_v58 }
 0x5b7   :  { %v2218_v4 = vadd.f32 %v2217_v43, %v2187_v34  ;;  %v2841_v22 = vpop.f32.mrb[40].mxu1 }
 0x5b8   :  { %v1787_v0 = vpop.f32.mrb[41].mxu1  ;;  %v2190_v45 = vmul.f32 %v4247_v37, %v2841_v22 }
 0x5b9   :  { %v2189_v18 = vmul.f32 %v4244_v57, %v1787_v0  ;;  %v2219_v24 = vadd.f32 %v2218_v4, %v2188_v55 }
 0x5bb   :  { %v2220_v50 = vadd.f32 %v2219_v24, %v2189_v18  ;;  %v2846_v19 = vpop.f32.mrb[22].mxu0 }
 0x5bc   :  { %v2192_v54 = vmul.f32 %v4226_v1, %v2846_v19  ;;  %v1886_v35 = vpop.f32.mrb[23].mxu0 }
 0x5bd   :  { %v2191_v53 = vmul.f32 %v4229_v42, %v1886_v35  ;;  %v2221_v17 = vadd.f32 %v2220_v50, %v2190_v45 }
 0x5bf   :  { %v2222_v60 = vadd.f32 %v2192_v54, %v2191_v53  ;;  %v2849_v27 = vpop.f32.mrb[24].mxu0  ;;  %2916 = vmatprep.mubr.f32.mxu1 %v2221_v17 }
 0x5c0   :  { %v1896_v25 = vpop.f32.mrb[25].mxu0  ;;  %v2194_v61 = vmul.f32 %v4235_v46, %v2849_v27 }
 0x5c1   :  { %v2193_v33 = vmul.f32 %v4232_v47, %v1896_v25 }
 0x5c3   :  { %v2223_v28 = vadd.f32 %v2222_v60, %v2193_v33  ;;  %v2852_v36 = vpop.f32.mrb[26].mxu0 }
 0x5c4   :  { %v1906_v20 = vpop.f32.mrb[27].mxu0  ;;  %v2196_v12 = vmul.f32 %v4241_v51, %v2852_v36  ;;  %v2365_v36 = vld [vmem:[#allocation13 + $0x78] sm:$0xff] }
 0x5c5   :  { %v2195_v40 = vmul.f32 %v4238_v26, %v1906_v20  ;;  %v2224_v44 = vadd.f32 %v2223_v28, %v2194_v61 }
 0x5c7   :  { %v2225_v13 = vadd.f32 %v2224_v44, %v2195_v40  ;;  %v2855_v48 = vpop.f32.mrb[28].mxu0 }
 0x5c8   :  { %v1916_v38 = vpop.f32.mrb[29].mxu0  ;;  %v2198_v52 = vmul.f32 %v4247_v37, %v2855_v48 }
 0x5c9   :  { %v2197_v49 = vmul.f32 %v4244_v57, %v1916_v38  ;;  %v2226_v39 = vadd.f32 %v2225_v13, %v2196_v12  ;;  %v2515_v38 = vld [vmem:[%s4302_s7 + $0x5] ss:$0 sm:$0xff] }
 0x5cb   :  { %v2227_v16 = vadd.f32 %v2226_v39, %v2197_v49  ;;  %v2860_v21 = vpop.f32.mrb[42].mxu1 }
 0x5cc   :  { %v2200_v29 = vmul.f32 %v4226_v1, %v2860_v21  ;;  %v2015_v59 = vpop.f32.mrb[43].mxu1 }
 0x5cd   :  { %v2228_v11 = vadd.f32 %v2227_v16, %v2198_v52  ;;  %v2199_v31 = vmul.f32 %v4229_v42, %v2015_v59 }
 0x5cf   :  { %v2229_v56 = vadd.f32 %v2200_v29, %v2199_v31  ;;  %v2863_v23 = vpop.f32.mrb[44].mxu1  ;;  %2917 = vmatmul.mubr.f32.vlgmr.msra.gmra.mrb[50].mxu1 %v2228_v11 }
 0x5d0   :  { %v2025_v14 = vpop.f32.mrb[45].mxu1  ;;  %v2202_v30 = vmul.f32 %v4235_v46, %v2863_v23 }
 0x5d1   :  { %v2201_v63 = vmul.f32 %v4232_v47, %v2025_v14 }
 0x5d3   :  { %v2230_v5 = vadd.f32 %v2229_v56, %v2201_v63  ;;  %v2866_v8 = vpop.f32.mrb[46].mxu1 }
 0x5d4   :  { %v2035_v62 = vpop.f32.mrb[47].mxu1  ;;  %v2204_v2 = vmul.f32 %v4241_v51, %v2866_v8 }
 0x5d5   :  { %v2203_v3 = vmul.f32 %v4238_v26, %v2035_v62  ;;  %v2231_v32 = vadd.f32 %v2230_v5, %v2202_v30 }
 0x5d7   :  { %v2232_v9 = vadd.f32 %v2231_v32, %v2203_v3  ;;  %v2869_v41 = vpop.f32.mrb[48].mxu1 }
 0x5d8   :  { %v2045_v10 = vpop.f32.mrb[49].mxu1  ;;  %v2206_v15 = vmul.f32 %v4247_v37, %v2869_v41 }
 0x5d9   :  { %v2205_v58 = vmul.f32 %v4244_v57, %v2045_v10  ;;  %v2233_v6 = vadd.f32 %v2232_v9, %v2204_v2 }
 0x5db   :  { %v2234_v7 = vadd.f32 %v2233_v6, %v2205_v58  ;;  %v2874_v34 = vpop.f32.mrb[30].mxu0 }
 0x5dc   :  { %v2208_v43 = vmul.f32 %v4226_v1, %v2874_v34  ;;  %v2144_v55 = vpop.f32.mrb[31].mxu0 }
 0x5dd   :  { %v2207_v4 = vmul.f32 %v4229_v42, %v2144_v55  ;;  %v2235_v22 = vadd.f32 %v2234_v7, %v2206_v15 }
 0x5df   :  { %v2236_v0 = vadd.f32 %v2208_v43, %v2207_v4  ;;  %v2877_v18 = vpop.f32.mrb[32].mxu0  ;;  %2919 = vmatprep.mubr.f32.mxu1 %v2235_v22 }
 0x5e0   :  { %v2154_v24 = vpop.f32.mrb[33].mxu0  ;;  %v2210_v50 = vmul.f32 %v4235_v46, %v2877_v18  ;;  %v2364_v46 = vld [vmem:[#allocation13 + $0x70] sm:$0xff] }
 0x5e1   :  { %v2209_v45 = vmul.f32 %v4232_v47, %v2154_v24  ;;  %v3116_v20 = vpack.c.bf16 %v2365_v36, %v2364_v46 }
 0x5e3   :  { %v2237_v19 = vadd.f32 %v2236_v0, %v2209_v45  ;;  %v2880_v54 = vpop.f32.mrb[34].mxu0  ;;  %3117 = vmatprep.subr.bf16.mxu0 %v3116_v20 }
 0x5e4   :  { %v2164_v35 = vpop.f32.mrb[35].mxu0  ;;  %v2212_v1 = vmul.f32 %v4241_v51, %v2880_v54  ;;  %3119 = vmatpush3.bf16.msra.mxu0 %v3116_v20 }
 0x5e5   :  { %v2211_v53 = vmul.f32 %v4238_v26, %v2164_v35  ;;  %v2238_v17 = vadd.f32 %v2237_v19, %v2210_v50  ;;  %v2514_v26 = vld [vmem:[%s4302_s7 + $0x4] ss:$0 sm:$0xff] }
 0x5e7   :  { %v2239_v60 = vadd.f32 %v2238_v17, %v2211_v53  ;;  %v2883_v27 = vpop.f32.mrb[36].mxu0 }
 0x5e8   :  { %v2174_v42 = vpop.f32.mrb[37].mxu0  ;;  %v2214_v61 = vmul.f32 %v4247_v37, %v2883_v27 }
 0x5e9   :  { %v2213_v25 = vmul.f32 %v4244_v57, %v2174_v42  ;;  %v2240_v33 = vadd.f32 %v2239_v60, %v2212_v1 }
 0x5eb   :  { %v2241_v28 = vadd.f32 %v2240_v33, %v2213_v25 }
 0x5ed   :  { %v2242_v47 = vadd.f32 %v2241_v28, %v2214_v61 }
 0x5ef   :  { %2920 = vmatmul.mubr.f32.gmra.mrb[52].mxu1 %v2242_v47 }
 0x6a2   :  { %v2918_v51 = vpop.f32.mrb[50].mxu1 }
 0x6a3   :  { %v2331_v40 = vpop.f32.mrb[51].mxu1  ;;  %v2337_v12 = vadd.f32 %v2918_v51, %v2514_v26 }
 0x6a4   :  { %v2332_v44 = vadd.f32 %v2514_v26, %v2331_v40 }
 0x6a6   :  { %2954 = vmatprep.mubr.f32.mxu0 %v2332_v44 }
 0x6a7   :  { %2955 = vmatmul.mubr.f32.vlgmr.msra.gmra.mrb[38].mxu0 %v2337_v12 }
 0x6c2   :  { %v2921_v57 = vpop.f32.mrb[52].mxu1 }
 0x6c3   :  { %v2341_v37 = vpop.f32.mrb[53].mxu1  ;;  %v2347_v48 = vadd.f32 %v2921_v57, %v2514_v26 }
 0x6c4   :  { %v2342_v13 = vadd.f32 %v2514_v26, %v2341_v37 }
 0x6c6   :  { %2957 = vmatprep.mubr.f32.mxu0 %v2342_v13 }
 0x6c7   :  { %2958 = vmatmul.mubr.f32.gmra.mrb[40].mxu0 %v2347_v48 }
 0x77a   :  { %v2956_v49 = vpop.f32.mrb[38].mxu0 }
 0x77b   :  { %v2444_v39 = vadd.f32 %v2956_v49, %v2515_v38  ;;  %v2438_v52 = vpop.f32.mrb[39].mxu0 }
 0x77c   :  { %v2439_v16 = vadd.f32 %v2515_v38, %v2438_v52 }
 0x77d   :  { %2458 = vst [vmem:[#allocation14 + $0x8] sm:$0xff] %v2444_v39 }
 0x77e   :  { %2457 = vst [vmem:[#allocation14] sm:$0xff] %v2439_v16 }
 0x79a   :  { %v2959_v21 = vpop.f32.mrb[40].mxu0 }
 0x79b   :  { %v2454_v29 = vadd.f32 %v2959_v21, %v2515_v38  ;;  %v2448_v59 = vpop.f32.mrb[41].mxu0 }
 0x79c   :  { %v2449_v11 = vadd.f32 %v2515_v38, %v2448_v59 }
 0x79d   :  { %2460 = vst [vmem:[#allocation14 + $0x18] sm:$0xff] %v2454_v29 }
 0x79e   :  { %2459 = vst [vmem:[#allocation14 + $0x10] sm:$0xff] %v2449_v11 }
 0x79f   :  { %3453 = shalt.err (!%p3450_p4)
}
 0x7a0   :  { %s3454_s5 = scalar_lea.hbm %s4303_s8, 512 }
 0x7a1   :  { %p3455_p5 = scmp.ne.s32.totalorder %s4303_s8, %s3454_s5  ;;  %p3458_p6 = scmp.lt.u32.totalorder %s3454_s5, %s4303_s8 }
 0x7a3   :  { %p3460_p7 = pnand %p3458_p6, %p3455_p5 }
 0x7a5   :  { %3463 = shalt.err (!%p3460_p7)
}
 0x7a6   :  { %2472 = dma.vmem_to_hbm [thread:$0]  %s2467_s1, 512, %s4303_s8, [#allocation4], %s3476_s17, %s3476_s17, %s3477_s18  }
 0x7a7   :  { %3472 = dma.done.wait [#allocation4], 512  }
 0x7a8   :  { %3473 = vsyncadd [#allocation4], 4294966784 }
 0x7a9   :  { %2476 = vsyncpa [#allocation3], 1 }
 0x7aa   :  { %2477 = vsyncpa [#allocation6], 1 }
 0x7ab   :  { %2478 = vsyncpa [#allocation9], 1 }
 0x7ac   :  { %2479 = vsyncpa [#allocation12], 1 }
 0x7ad   :  { %2480 = vsyncpa [#allocation4], 1 }

</bundles_post_ra>
